<compile_context>
chip_gen: v5e
topology: v5e:2x2
jax: 0.10.0
libtpu: 0.0.40
codegen_flags: <defaults>
</compile_context>

<pallas_src>
import numpy as np
import jax
import jax.numpy as jnp
from jax import lax
from jax.experimental import pallas as pl
from jax.experimental.pallas import tpu as pltpu


def _round_up(x, m):
    return (x + m - 1) // m * m


# -----------------------------------------------------------------------------
# Tiled linear: y = x @ w + b   (bf16 MXU operands, f32 accumulation)
# -----------------------------------------------------------------------------
def _matmul_kernel(x_ref, w_ref, b_ref, o_ref, acc_ref):
    k = pl.program_id(2)

    @pl.when(k == 0)
    def _():
        # Fold the bias into the accumulator init (no extra add at finalize).
        acc_ref[...] = jnp.broadcast_to(b_ref[...], acc_ref.shape)

    acc_ref[...] += jnp.dot(x_ref[...], w_ref[...],
                            preferred_element_type=jnp.float32)

    @pl.when(k == pl.num_programs(2) - 1)
    def _():
        o_ref[...] = acc_ref[...].astype(o_ref.dtype)


def pallas_linear(x, w, b, *, out_dtype=jnp.float32,
                  tm_max=256, tn_max=512, tk_max=1024):
    """x: (M, K), w: (K, N), b: (N,)  ->  (M, N) in out_dtype."""
    M, K = x.shape
    N = w.shape[1]
    # bf16 LHS packs sublanes in pairs -> round M tiles to 16; lanes to 128.
    tm = min(tm_max, _round_up(M, 16))
    tn = min(tn_max, _round_up(N, 128))
    tk = min(tk_max, _round_up(K, 128))
    Mp, Np, Kp = _round_up(M, tm), _round_up(N, tn), _round_up(K, tk)

    xb = x.astype(jnp.bfloat16)
    if (Mp, Kp) != (M, K):
        xb = jnp.pad(xb, ((0, Mp - M), (0, Kp - K)))
    wb = w if w.dtype == jnp.bfloat16 else w.astype(jnp.bfloat16)
    if (Kp, Np) != (K, N):
        wb = jnp.pad(wb, ((0, Kp - K), (0, Np - N)))
    bb = b.astype(jnp.float32).reshape(1, -1)
    if Np != N:
        bb = jnp.pad(bb, ((0, 0), (0, Np - N)))

    out = pl.pallas_call(
        _matmul_kernel,
        out_shape=jax.ShapeDtypeStruct((Mp, Np), out_dtype),
        grid_spec=pltpu.PrefetchScalarGridSpec(
            num_scalar_prefetch=0,
            grid=(Mp // tm, Np // tn, Kp // tk),
            in_specs=[
                pl.BlockSpec((tm, tk), lambda i, j, k: (i, k)),   # x tile
                pl.BlockSpec((tk, tn), lambda i, j, k: (k, j)),   # w tile
                pl.BlockSpec((1, tn), lambda i, j, k: (0, j)),    # bias tile
            ],
            out_specs=pl.BlockSpec((tm, tn), lambda i, j, k: (i, j)),
            scratch_shapes=[pltpu.VMEM((tm, tn), jnp.float32)],
        ),
        compiler_params=pltpu.CompilerParams(
            dimension_semantics=("parallel", "parallel", "arbitrary"),
            vmem_limit_bytes=48 * 1024 * 1024),
    )(xb, wb, bb)
    if (Mp, Np) != (M, N):
        out = out[:M, :N]
    return out


# -----------------------------------------------------------------------------
# GRU recurrence.  Input-side gate projections (x@W_i + b_i) are precomputed
# outside (one big time-parallel GEMM); the in-kernel loop does only one
# (tb,Hp)@(Hp,3Hp) matmul per step.  Gate order matches PyTorch nn.GRU:
# r, z, n ;  n = tanh(gx_n + r*(h@W_hn+b_hn)).
# Grid: (batch_blocks [parallel], time_blocks [arbitrary]); gx/out are streamed
# per time block (double-buffered DMA overlapped with compute); W_h/b_h stay
# resident; h carries across time blocks in a small VMEM scratch and is kept
# in vregs (fori_loop carry) within a block.
# -----------------------------------------------------------------------------
def _gru_kernel(gx_ref, h0_ref, wh_ref, bh_ref, out_ref, h_scratch):
    tt = gx_ref.shape[0]
    Hp = h_scratch.shape[1]

    # New batch block (time axis restarts): load the initial hidden state.
    @pl.when(pl.program_id(1) == 0)
    def _():
        h_scratch[...] = h0_ref[...]

    w = wh_ref[...]          # (Hp, 3Hp) bf16, resident (constant block index)
    b = bh_ref[...]          # (1, 3Hp) f32

    def step(t, h):
        gh = jnp.dot(h.astype(jnp.bfloat16), w,
                     preferred_element_type=jnp.float32) + b      # (tb, 3Hp) f32
        gx = gx_ref[t].astype(jnp.float32)                        # (tb, 3Hp) f32
        r = jax.nn.sigmoid(gx[:, 0 * Hp:1 * Hp] + gh[:, 0 * Hp:1 * Hp])
        z = jax.nn.sigmoid(gx[:, 1 * Hp:2 * Hp] + gh[:, 1 * Hp:2 * Hp])
        n = jnp.tanh(gx[:, 2 * Hp:3 * Hp] + r * gh[:, 2 * Hp:3 * Hp])
        h_new = (1.0 - z) * n + z * h
        out_ref[t] = h_new.astype(out_ref.dtype)
        return h_new

    # h lives in vregs inside the block; scratch only carries it across blocks.
    h_final = lax.fori_loop(0, tt, step, h_scratch[...], unroll=2)
    h_scratch[...] = h_final


def pallas_gru(gx, h0, w_h, b_h):
    """gx: (Tp, Bp, 3Hp) bf16, h0: (Bp, Hp) f32, w_h: (Hp, 3Hp) bf16,
    b_h: (1, 3Hp) f32  ->  all hidden states (Tp, Bp, Hp) bf16."""
    Tp, Bp, threeHp = gx.shape
    Hp = h0.shape[1]
    tt = min(Tp, 8)
    # 2 batch blocks (>= 8 rows each) so the recurrence shards across both
    # v7x TensorCores; harmless (single core iterates them) on v5e/v6e.
    tb = Bp // 2 if (Bp >= 16 and Bp % 16 == 0) else Bp
    return pl.pallas_call(
        _gru_kernel,
        out_shape=jax.ShapeDtypeStruct((Tp, Bp, Hp), jnp.bfloat16),
        grid_spec=pltpu.PrefetchScalarGridSpec(
            num_scalar_prefetch=0,
            grid=(Bp // tb, Tp // tt),
            in_specs=[
                pl.BlockSpec((tt, tb, threeHp), lambda b, t: (t, b, 0)),  # gate tile
                pl.BlockSpec((tb, Hp), lambda b, t: (b, 0)),              # h0 block
                pl.BlockSpec((Hp, threeHp), lambda b, t: (0, 0)),         # W_h resident
                pl.BlockSpec((1, threeHp), lambda b, t: (0, 0)),          # b_h resident
            ],
            out_specs=pl.BlockSpec((tt, tb, Hp), lambda b, t: (t, b, 0)),
            scratch_shapes=[pltpu.VMEM((tb, Hp), jnp.float32)],  # h across time blocks
        ),
        compiler_params=pltpu.CompilerParams(
            dimension_semantics=("parallel", "arbitrary"),
            vmem_limit_bytes=48 * 1024 * 1024),
    )(gx, h0, w_h, b_h)


# -----------------------------------------------------------------------------
# Model: parameters + one-time prep + forward
# -----------------------------------------------------------------------------
def init_params(key, d_vocab, d_embed, d_hidden, d_img_flat, d_feat=2048):
    ks = jax.random.split(key, 20)
    s = 0.02

    def rnd(k, shape, scale=s):
        return scale * jax.random.normal(k, shape, dtype=jnp.float32)

    p = {
        # TODO(synk): ImageEncoder1 is not defined in the provided source
        # (presumably a ResNet backbone producing 2048-d features); stand-in
        # here is a single linear projection of the flattened image to 2048.
        "w_enc": rnd(ks[0], (d_img_flat, d_feat)),
        "b_enc": rnd(ks[1], (d_feat,)),
        "w_fc_h": rnd(ks[2], (d_feat, d_hidden)),
        "b_fc_h": rnd(ks[3], (d_hidden,)),
        "embed": rnd(ks[4], (d_vocab, d_embed), 0.1),
        # GRU weights stored transposed (in_dim, H); gate order r, z, n.
        "w_ir": rnd(ks[5], (d_embed, d_hidden), 0.1),
        "w_iz": rnd(ks[6], (d_embed, d_hidden), 0.1),
        "w_in": rnd(ks[7], (d_embed, d_hidden), 0.1),
        "w_hr": rnd(ks[8], (d_hidden, d_hidden), 0.1),
        "w_hz": rnd(ks[9], (d_hidden, d_hidden), 0.1),
        "w_hn": rnd(ks[10], (d_hidden, d_hidden), 0.1),
        "b_ir": rnd(ks[11], (d_hidden,), 0.1),
        "b_iz": rnd(ks[12], (d_hidden,), 0.1),
        "b_in": rnd(ks[13], (d_hidden,), 0.1),
        "b_hr": rnd(ks[14], (d_hidden,), 0.1),
        "b_hz": rnd(ks[15], (d_hidden,), 0.1),
        "b_hn": rnd(ks[16], (d_hidden,), 0.1),
        "w_logits": rnd(ks[17], (d_hidden, d_vocab), 0.1),
        "b_logits": rnd(ks[18], (d_vocab,), 0.1),
    }
    return p


def prepare_params(p):
    """One-time weight prep: bf16 cast, fused GRU gate matrices, lane padding.
    Done once (not per pallas_linear call) so no per-forward astype/pad of the
    large weight matrices."""
    H = p["b_fc_h"].shape[0]
    Hp = _round_up(H, 128)

    def pad_h(a):  # pad last dim H -> Hp with zeros
        return jnp.pad(a, [(0, 0)] * (a.ndim - 1) + [(0, Hp - H)])

    W_i = jnp.concatenate([pad_h(p["w_ir"]), pad_h(p["w_iz"]),
                           pad_h(p["w_in"])], axis=1).astype(jnp.bfloat16)   # (E, 3Hp)
    b_i = jnp.concatenate([pad_h(p["b_ir"]), pad_h(p["b_iz"]),
                           pad_h(p["b_in"])])                                # (3Hp,)
    W_h = jnp.concatenate([pad_h(p["w_hr"]), pad_h(p["w_hz"]),
                           pad_h(p["w_hn"])], axis=1)                        # (H, 3Hp)
    W_h = jnp.pad(W_h, ((0, Hp - H), (0, 0))).astype(jnp.bfloat16)           # (Hp, 3Hp)
    b_h = jnp.concatenate([pad_h(p["b_hr"]), pad_h(p["b_hz"]),
                           pad_h(p["b_hn"])]).reshape(1, -1)                 # (1, 3Hp)

    return {
        "H": H, "Hp": Hp,
        "w_enc": p["w_enc"].astype(jnp.bfloat16),
        "b_enc": p["b_enc"],
        # fc_h pre-padded to Hp columns so h0 leaves the GEMM already
        # lane-padded; padded columns are exactly zero, consistent with the
        # zero-padded GRU gates (padded hidden dims stay 0 through recurrence).
        "w_fc_h": pad_h(p["w_fc_h"]).astype(jnp.bfloat16),                   # (2048, Hp)
        "b_fc_h": pad_h(p["b_fc_h"]),                                        # (Hp,)
        "embed": p["embed"],
        "W_i": W_i, "b_i": b_i, "W_h": W_h, "b_h": b_h,
        "w_logits": jnp.pad(p["w_logits"],
                            ((0, Hp - H), (0, 0))).astype(jnp.bfloat16),     # (Hp, V)
        "b_logits": p["b_logits"],
    }


def packed_indices(cap_lens_np):
    """pack_padded_sequence(batch_first=True).data ordering (enforce_sorted=True)."""
    cap_lens_np = np.asarray(cap_lens_np)
    assert np.all(np.diff(cap_lens_np) <= 0), \
        "cap_lens must be sorted descending (enforce_sorted=True)"
    T = int(cap_lens_np.max())
    b_idx, t_idx = [], []
    for t in range(T):
        for b in range(len(cap_lens_np)):
            if cap_lens_np[b] > t:
                b_idx.append(b)
                t_idx.append(t)
    return np.asarray(b_idx, np.int32), np.asarray(t_idx, np.int32)


def img2txt_forward(images, captions, cap_lens_np, prep):
    B, T = captions.shape
    Hp = prep["Hp"]
    E = prep["embed"].shape[1]

    Bp = _round_up(B, 16)      # 2 GRU batch blocks of >= 8 rows each
    Tp = _round_up(T, 8)       # GRU time-axis tile multiple

    # ---- encoder + initial hidden (tiled GEMMs) ----
    feat_in = images.reshape(B, -1)                                    # (B, 3*H*W)
    features = pallas_linear(feat_in, prep["w_enc"], prep["b_enc"])    # (B, 2048) == self.enc(images)
    h0 = pallas_linear(features, prep["w_fc_h"], prep["b_fc_h"])       # (B, Hp)   == fc_h (padded cols = 0)
    h0p = jnp.pad(h0, ((0, Bp - B), (0, 0)))                           # (Bp, Hp)

    # ---- embedding gather, time-major + batch-padded BEFORE the W_i GEMM ----
    # (so gx needs no post-GEMM transpose/pad)
    emb_tm = jnp.take(prep["embed"], captions.T, axis=0)               # (T, B, E)
    emb_tm = jnp.pad(emb_tm, ((0, Tp - T), (0, Bp - B), (0, 0)))       # (Tp, Bp, E)

    # ---- hoisted, time-parallel input projection; emitted directly as bf16 ----
    gx = pallas_linear(emb_tm.reshape(Tp * Bp, E), prep["W_i"], prep["b_i"],
                       out_dtype=jnp.bfloat16)                         # (Tp*Bp, 3Hp)
    gx = gx.reshape(Tp, Bp, 3 * Hp)                                    # row-major: free

    # ---- recurrence: time-tiled grid, batch-parallel, bf16 outputs ----
    outs_tm = pallas_gru(gx, h0p, prep["W_h"], prep["b_h"])            # (Tp, Bp, Hp) bf16

    # ---- packed-sequence rows straight from the time-major slab (no transpose) ----
    b_idx, t_idx = packed_indices(cap_lens_np)
    flat_idx = jnp.asarray(t_idx * Bp + b_idx, dtype=jnp.int32)
    packed = jnp.take(outs_tm.reshape(Tp * Bp, Hp), flat_idx, axis=0)  # (N_packed, Hp)
    # TODO(synk): fuse this gather into the logits GEMM via scalar-prefetched
    #             row indices to avoid materializing the packed buffer.

    logits = pallas_linear(packed, prep["w_logits"], prep["b_logits"])  # (N_packed, V)
    return logits


# -----------------------------------------------------------------------------
# Pure-JAX f32 reference (for a sanity check)
# -----------------------------------------------------------------------------
def ref_forward(images, captions, cap_lens_np, p):
    B = images.shape[0]
    feat_in = images.reshape(B, -1)
    features = feat_in @ p["w_enc"] + p["b_enc"]
    h0 = features @ p["w_fc_h"] + p["b_fc_h"]
    emb = p["embed"][captions]

    def step(h, x_t):
        r = jax.nn.sigmoid(x_t @ p["w_ir"] + p["b_ir"] + h @ p["w_hr"] + p["b_hr"])
        z = jax.nn.sigmoid(x_t @ p["w_iz"] + p["b_iz"] + h @ p["w_hz"] + p["b_hz"])
        n = jnp.tanh(x_t @ p["w_in"] + p["b_in"] + r * (h @ p["w_hn"] + p["b_hn"]))
        h_new = (1.0 - z) * n + z * h
        return h_new, h_new

    _, outs_t = jax.lax.scan(step, h0, jnp.swapaxes(emb, 0, 1))
    outs = jnp.swapaxes(outs_t, 0, 1)
    b_idx, t_idx = packed_indices(cap_lens_np)
    packed = outs[b_idx, t_idx]
    return packed @ p["w_logits"] + p["b_logits"]


# -----------------------------------------------------------------------------
if __name__ == "__main__":
    # small shapes consistent with the module's forward
    d_vocab, d_embed, d_hidden = 32, 16, 32
    start_token, end_token = 1, 2          # unused in forward(), kept for fidelity
    B, C, S, T = 2, 3, 16, 8               # batch, channels, image size, max seq len

    key = jax.random.PRNGKey(0)
    k_img, k_cap, k_par = jax.random.split(key, 3)

    images = jax.random.normal(k_img, (B, C, S, S), dtype=jnp.float32)
    captions = jax.random.randint(k_cap, (B, T), 0, d_vocab, dtype=jnp.int32)
    cap_lens = np.array([8, 5], dtype=np.int32)     # descending (enforce_sorted=True)

    params = init_params(k_par, d_vocab, d_embed, d_hidden, d_img_flat=C * S * S)
    prep = prepare_params(params)                   # one-time bf16 / fused weight prep

    logits = img2txt_forward(images, captions, cap_lens, prep)
    logits = jax.block_until_ready(logits)

    expected_rows = int(cap_lens.sum())
    assert logits.shape == (expected_rows, d_vocab), logits.shape

    ref = jax.block_until_ready(ref_forward(images, captions, cap_lens, params))
    if not np.allclose(np.asarray(logits), np.asarray(ref), atol=5e-2, rtol=5e-2):
        raise AssertionError("Pallas output does not match JAX reference")

    print("KERNEL_OK")
</pallas_src>

<mosaic_0001>
module attributes {stable_mosaic.version = 11 : i64} {
  func.func @_matmul_kernel(%arg0: i32, %arg1: i32, %arg2: i32, %arg3: memref<16x768xbf16, #tpu.memory_space<vmem>>, %arg4: memref<768x512xbf16, #tpu.memory_space<vmem>>, %arg5: memref<1x512xf32, #tpu.memory_space<vmem>>, %arg6: memref<16x512xf32, #tpu.memory_space<vmem>>, %arg7: memref<16x512xf32, #tpu.memory_space<vmem>>) attributes {dimension_semantics = [#tpu.dimension_semantics<parallel>, #tpu.dimension_semantics<parallel>, #tpu.dimension_semantics<arbitrary>], iteration_bounds = array<i64: 1, 4, 1>, scalar_prefetch = 0 : i64, scratch_operands = 1 : i64, tpu.core_type = #tpu.core_type<tc>, window_params = [{transform_indices = @transform_0, window_bounds = array<i64: 16, 768>}, {transform_indices = @transform_1, window_bounds = array<i64: 768, 512>}, {transform_indices = @transform_2, window_bounds = array<i64: 1, 512>}, {transform_indices = @transform_3, window_bounds = array<i64: 16, 512>}]} {
    %c0_i32 = arith.constant 0 : i32
    %0 = arith.cmpi eq, %arg2, %c0_i32 : i32
    %1 = arith.extui %0 : i1 to i32
    %c0_i32_0 = arith.constant 0 : i32
    %2 = arith.cmpi ne, %1, %c0_i32_0 : i32
    scf.if %2 {
      %c0_10 = arith.constant 0 : index
      %c0_11 = arith.constant 0 : index
      %12 = vector.load %arg5[%c0_10, %c0_11] : memref<1x512xf32, #tpu.memory_space<vmem>>, vector<1x512xf32>
      %13 = vector.shape_cast %12 : vector<1x512xf32> to vector<1x512xf32>
      %14 = vector.broadcast %13 : vector<1x512xf32> to vector<16x512xf32>
      %c0_12 = arith.constant 0 : index
      %c0_13 = arith.constant 0 : index
      %15 = vector.load %arg7[%c0_12, %c0_13] : memref<16x512xf32, #tpu.memory_space<vmem>>, vector<16x512xf32>
      tpu.vector_store %arg7[%c0_12, %c0_13], %14 {strides = array<i32>} : memref<16x512xf32, #tpu.memory_space<vmem>>, vector<16x512xf32>,
    } else {
    }
    %c0 = arith.constant 0 : index
    %c0_1 = arith.constant 0 : index
    %3 = vector.load %arg7[%c0, %c0_1] : memref<16x512xf32, #tpu.memory_space<vmem>>, vector<16x512xf32>
    %c0_2 = arith.constant 0 : index
    %c0_3 = arith.constant 0 : index
    %4 = vector.load %arg3[%c0_2, %c0_3] : memref<16x768xbf16, #tpu.memory_space<vmem>>, vector<16x768xbf16>
    %c0_4 = arith.constant 0 : index
    %c0_5 = arith.constant 0 : index
    %5 = vector.load %arg4[%c0_4, %c0_5] : memref<768x512xbf16, #tpu.memory_space<vmem>>, vector<768x512xbf16>
    %cst = arith.constant dense<0.000000e+00> : vector<16x512xf32>
    %6 = tpu.matmul %4, %5, %cst {dimension_numbers = #tpu.dot_dimension_numbers<[1], [0], [0], [1], [0, 0, 1, 1], [], []>} : vector<16x768xbf16>, vector<768x512xbf16>, vector<16x512xf32> -> vector<16x512xf32>
    %7 = arith.addf %3, %6 : vector<16x512xf32>
    %c0_6 = arith.constant 0 : index
    %c0_7 = arith.constant 0 : index
    %8 = vector.load %arg7[%c0_6, %c0_7] : memref<16x512xf32, #tpu.memory_space<vmem>>, vector<16x512xf32>
    tpu.vector_store %arg7[%c0_6, %c0_7], %7 {strides = array<i32>} : memref<16x512xf32, #tpu.memory_space<vmem>>, vector<16x512xf32>,
    %c0_i32_8 = arith.constant 0 : i32
    %9 = arith.cmpi eq, %arg2, %c0_i32_8 : i32
    %10 = arith.extui %9 : i1 to i32
    %c0_i32_9 = arith.constant 0 : i32
    %11 = arith.cmpi ne, %10, %c0_i32_9 : i32
    scf.if %11 {
      %c0_10 = arith.constant 0 : index
      %c0_11 = arith.constant 0 : index
      %12 = vector.load %arg7[%c0_10, %c0_11] : memref<16x512xf32, #tpu.memory_space<vmem>>, vector<16x512xf32>
      %c0_12 = arith.constant 0 : index
      %c0_13 = arith.constant 0 : index
      %13 = vector.load %arg6[%c0_12, %c0_13] : memref<16x512xf32, #tpu.memory_space<vmem>>, vector<16x512xf32>
      tpu.vector_store %arg6[%c0_12, %c0_13], %12 {strides = array<i32>} : memref<16x512xf32, #tpu.memory_space<vmem>>, vector<16x512xf32>,
    } else {
    }
    return
  }
  func.func @transform_0(%arg0: i32, %arg1: i32, %arg2: i32) -> (i32, i32) {
    %c0_i32 = arith.constant 0 : i32
    return %arg0, %arg2 : i32, i32
  }
  func.func @transform_1(%arg0: i32, %arg1: i32, %arg2: i32) -> (i32, i32) {
    %c0_i32 = arith.constant 0 : i32
    return %arg2, %arg1 : i32, i32
  }
  func.func @transform_2(%arg0: i32, %arg1: i32, %arg2: i32) -> (i32, i32) {
    %c0_i32 = arith.constant 0 : i32
    %c0_i32_0 = arith.constant 0 : i32
    return %c0_i32, %arg1 : i32, i32
  }
  func.func @transform_3(%arg0: i32, %arg1: i32, %arg2: i32) -> (i32, i32) {
    %c0_i32 = arith.constant 0 : i32
    return %arg0, %arg1 : i32, i32
  }
}

</mosaic_0001>

<bundles_post_ra>
// kernel: tpu_custom_call.1
= control target key start
LH: loop header
LB: loop body
LE: loop exit
PB: predicated region body
PF: predicated region fallthrough
CT: control target
= control target key end

     0   :  { %s3933_s0 = inlined_call_operand.hbm [shape: bf16[16,768], index: 0, kind: input, shape index: {}]   ;;  %s3934_s1 = inlined_call_operand.hbm [shape: bf16[768,2048], index: 1, kind: input, shape index: {}]   ;;  %s3935_s2 = inlined_call_operand.hbm [shape: f32[1,2048], index: 2, kind: input, shape index: {}]   ;;  %s3936_s3 = inlined_call_operand.hbm [shape: f32[16,2048], index: 3, kind: output, shape index: {}]  }
   0x1   :  { %3937 = sst [smem:[#allocation13_spill]] %s3933_s0 }
   0x2   :  { %3938 = sst [smem:[#allocation14_spill]] %s3934_s1 }
   0x3   :  { %8 = vsyncpa [#allocation4], 0 }
   0x4   :  { %9 = vsyncpa [#allocation7], 0 }
   0x5   :  { %11 = vsyncpa [#allocation7 + $0x1], 0 }
   0x6   :  { %12 = vsyncpa [#allocation5], 0 }
   0x7   :  { %14 = vsyncpa [#allocation5 + $0x1], 0  ;;  %s3330_s12 = smov 0   ;;  %s3332_s13 = smov 0  }
   0x8   :  { %s3334_s14 = smov 0   ;;  %s3336_s15 = smov 0  }
   0x9   :  { %s3338_s16 = smov 0   ;;  %s3340_s17 = smov 0  }
   0xa LB: > { %s35_s18 = sadd.s32 1, %s3295_s16  ;;  %s76_s19 = sadd.s32 1, %s3287_s14  ;;  %s3299_s17 = sphi %s3340_s17, %s20_s17   ;;  %s3295_s16 = sphi %s3338_s16, %s3950_s16   ;;  %s3291_s15 = sphi %s3336_s15, %s3949_s15   ;;  %s3287_s14 = sphi %s3334_s14, %s3948_s14   ;;  %s3283_s13 = sphi %s3332_s13, %s3947_s13   ;;  %s3279_s12 = sphi %s3330_s12, %s3946_s12  }
   0xb   : > { %p37_p0 = scmp.ge.s32.totalorder %s35_s18, 4  ;;  %p83_p1 = scmp.ne.s32.totalorder %s3287_s14, %s3283_s13 }
   0xc   : > { %p84_p2 = scmp.eq.s32.totalorder %s3299_s17, 0  ;;  %p3063_p4 = scmp.lt.s32.totalorder %s3299_s17, 4 }
   0xd   : > { %s3952_s18 = smov (%p37_p0, %s35_s18), 0  ;;  %s187_s21 = sand.u32 1, %s3299_s17  }
   0xe   : > { %p85_p3 = por %p84_p2, %p83_p1  ;;  %s72_s20 = ssub.s32 %s3295_s16, %s3952_s18 }
   0xf   : > { %p74_p5 = scmp.eq.s32.totalorder %s72_s20, 0  ;;  %s189_s22 = sand.u32 1, %s3287_s14  }
  0x10   : > { %s2835_s23 = sshll.u32 %s3295_s16, 4  ;;  %s3035_s25 = smul.u32 1536, %s189_s22 }
  0x11   : > { %s3377_s24 = scalar_select %p74_p5, %s3287_s14, %s76_s19  }
  0x12   : > { %s3939_s1 = sld [smem:[#allocation14_spill]]  ;;  %p3384_p6 = pnand %p3063_p4, %p85_p3 }
  0x13   : > { %s191_s4 = scalar_lea.vmem [#allocation6], %s3035_s25  ;;  %s3388_s6 = scalar_lea.sflag [#allocation7], %s187_s21 }
  0x14   : > { %s202_s5 = sshll.u32 %s191_s4, 4  ;;  %s3301_s7 = smov 1024   ;;  %s203_s5 = int_to_ptr.vmem [resolvable:$true] %s202_s5 }
  0x15   : > { %s3302_s8 = smov 256   ;;  %s3303_s9 = smov 16  }
  0x16   : > { %s3394_s10 = sadd.s32 4294967295, %s3299_s17   ;;  %s2026_s11 = sadd.s32 4294967294, %s3299_s17  }
  0x17   : > { %p89_p7 = scmp.ne.s32.totalorder %s3283_s13, %s3279_s12  ;;  %p90_p8 = scmp.eq.s32.totalorder %s3394_s10, 0 }
  0x18   : > { %s199_s28 = scalar_lea.hbm %s3939_s1, %s2835_s23  ;;  %p141_p9 = scmp.eq.s32.totalorder %s3394_s10, 3 }
  0x19   : > { %s200_s29 = sshll.u32 %s199_s28, 4  ;;  %p147_p10 = scmp.eq.s32.totalorder %s2026_s11, 3  ;;  %s201_s29 = int_to_ptr.hbm [resolvable:$true] %s200_s29 }
  0x1a   : > { %3054 = dma.hbm_to_vmem [thread:$0]  (!%p3384_p6), %s201_s29, 24576, %s203_s5, %s3388_s6, %s3301_s7, %s3302_s8, %s3303_s9  }
  0x1b   : > { %p3403_p11 = por %p90_p8, %p89_p7  ;;  %p2027_p12 = scmp.ge.s32.totalorder %s3299_s17, 1 }
  0x1c   : > { %p3411_p13 = por %p141_p9, %p83_p1  ;;  %p3415_p0 = por %p147_p10, %p89_p7 }
  0x1d   : > { %p154_p2 = scmp.lt.s32.totalorder %s3299_s17, 5  ;;  %s3944_s0 = sld [smem:[#allocation13_spill]] }
  0x1e   : > { %s3304_s28 = smov [#allocation3]   ;;  %s2032_s4 = sshll.u32 %s189_s22, 2 }
  0x1f   : > { %p3423_p3 = pnand %p2027_p12, %p154_p2  ;;  %s173_s29 = sshll.u32 %s3304_s28, 4  ;;  %s174_s29 = int_to_ptr.vmem [resolvable:$true] %s173_s29 }
  0x20   : > { %s2033_s5 = sshll.u32 %s3295_s16, 2  ;;  %s216_s7 = scalar_lea.vmem [#allocation8], %s2032_s4 }
  0x21   : > { %p3047_p1 = pneg %p3423_p3  ;;  %s224_s8 = sshll.u32 %s216_s7, 4  ;;  %s225_s8 = int_to_ptr.vmem [resolvable:$true] %s224_s8 }
  0x22   : > { %s220_s23 = scalar_lea.hbm %s3935_s2, %s2033_s5  ;;  %s3305_s25 = smov 384  }
  0x23   : > { %s171_s26 = sshll.u32 %s3944_s0, 4  ;;  %p3048_p4 = pnand %p3047_p1, %p90_p8  ;;  %s172_s26 = int_to_ptr.hbm [resolvable:$true] %s171_s26 }
  0x24   : > { %s3306_s0 = smov 24   ;;  %s222_s1 = sshll.u32 %s220_s23, 4  ;;  %s223_s1 = int_to_ptr.hbm [resolvable:$true] %s222_s1 }
  0x25   : > { %3050 = dma.hbm_to_vmem [thread:$0]  (!%p3048_p4), %s172_s26, 768, %s174_s29, [#allocation4], %s3305_s25, %s3305_s25, %s3306_s0  }
  0x26   : > { %3057 = dma.hbm_to_vmem [thread:$0]  (!%p3384_p6), %s223_s1, 64, %s225_s8, %s3388_s6  }
  0x27   : > { %233 = sbr.rel (%p3423_p3) target bundleno = 397 (0x18d), region = 32 }
  0x2c   : > { %3266 = dma.done.wait (%p90_p8), [#allocation4], 768  }
  0x2d   : > { %3268 = vsyncadd (%p90_p8), [#allocation4], 4294966528  ;;  %s240_s22 = sand.u32 1, %s3394_s10   ;;  %s3448_s28 = sand.u32 1, %s3283_s13  }
  0x2e   : > { %s3036_s0 = smul.u32 1536, %s3448_s28  ;;  %s241_s26 = scalar_lea.sflag [#allocation7], %s240_s22 }
  0x30   : > { %s3451_s30 = scalar_lea.vmem [#allocation6], %s3036_s0 }
  0x31   : > { %3270 = dma.done.wait (%p3403_p11), %s241_s26, 24640  }
  0x32   : > { %3272 = vsyncadd (%p3403_p11), %s241_s26, 4294942656  ;;  %v2176_v0 = vld [vmem:[%s3451_s30 + $0xe0] sm:$0xf]  ;;  %v2872_v1 = vld [vmem:[%s3451_s30 + $0xec] sm:$0xf0]  ;;  %s2036_s1 = sshll.u32 %s3448_s28, 2 }
  0x33   : > { %v2304_v2 = vld [vmem:[%s3451_s30 + $0x1e0] sm:$0xf]  ;;  %v2177_v3 = vor.u32 %v2872_v1, %v2176_v0  ;;  %v2904_v4 = vld [vmem:[%s3451_s30 + $0x1ec] sm:$0xf0]  ;;  %s254_s6 = scalar_lea.vmem [#allocation8], %s2036_s1  ;;  %s2037_s10 = sshll.u32 %s3448_s28, 6 }
  0x34   : > { %v2432_v5 = vld [vmem:[%s3451_s30 + $0x2e0] sm:$0xf]  ;;  %v2936_v6 = vld [vmem:[%s3451_s30 + $0x2ec] sm:$0xf0]  ;;  %v2305_v7 = vor.u32 %v2904_v4, %v2304_v2  ;;  %s3882_s19 = scalar_lea.vmem [#allocation9], %s2037_s10  ;;  %s3034_s27 = sshll.u32 %s3291_s15, 5 }
  0x35   : > { %v2433_v8 = vor.u32 %v2936_v6, %v2432_v5  ;;  %v2560_v9 = vld [vmem:[%s3451_s30 + $0x3e0] sm:$0xf]  ;;  %v2968_v10 = vld [vmem:[%s3451_s30 + $0x3ec] sm:$0xf0]  ;;  %1508 = vmatpush.bf16.msra.mxu0 %v2177_v3  ;;  %s1894_s5 = scalar_lea.hbm %s3936_s3, %s3034_s27  ;;  %s1895_s7 = sshll.u32 %s3882_s19, 4  ;;  %s1896_s7 = int_to_ptr.vmem [resolvable:$true] %s1895_s7 }
  0x36   : > { %v2160_v11 = vld [vmem:[%s3451_s30 + $0xc0] sm:$0xf]  ;;  %v2561_v12 = vor.u32 %v2968_v10, %v2560_v9  ;;  %v2868_v13 = vld [vmem:[%s3451_s30 + $0xcc] sm:$0xf0]  ;;  %1522 = vmatpush.bf16.msra.mxu1 %v2305_v7  ;;  %s1897_s8 = sshll.u32 %s1894_s5, 4  ;;  %s1880_s15 = scalar_lea.sflag [#allocation5], %s3448_s28  ;;  %s1898_s8 = int_to_ptr.hbm [resolvable:$true] %s1897_s8 }
  0x37   : > { %v2288_v14 = vld [vmem:[%s3451_s30 + $0x1c0] sm:$0xf]  ;;  %v2900_v15 = vld [vmem:[%s3451_s30 + $0x1cc] sm:$0xf0]  ;;  %1536 = vmatpush.bf16.msra.mxu2 %v2433_v8  ;;  %v2161_v16 = vor.u32 %v2868_v13, %v2160_v11  ;;  %s3227_s9 = sshra.s32 %s1898_s8, 4  ;;  %s3233_s22 = scalar_lea.hbm %s3936_s3, 256  ;;  %s3228_s9 = int_to_ptr.hbm [resolvable:$true] %s3227_s9 }
  0x38   : > { %v2289_v17 = vor.u32 %v2900_v15, %v2288_v14  ;;  %v2416_v18 = vld [vmem:[%s3451_s30 + $0x2c0] sm:$0xf]  ;;  %v2932_v19 = vld [vmem:[%s3451_s30 + $0x2cc] sm:$0xf0]  ;;  %1550 = vmatpush.bf16.msra.mxu3 %v2561_v12  ;;  %s3229_s11 = scalar_lea.hbm %s3228_s9, 64  ;;  %p3234_p8 = scmp.lt.s32.totalorder %s3228_s9, %s3936_s3 }
  0x39   : > { %v2544_v20 = vld [vmem:[%s3451_s30 + $0x3c0] sm:$0xf]  ;;  %v2417_v21 = vor.u32 %v2932_v19, %v2416_v18  ;;  %v2964_v22 = vld [vmem:[%s3451_s30 + $0x3cc] sm:$0xf0]  ;;  %1509 = vmatpush.bf16.msra.mxu0 %v2161_v16  ;;  %p3230_p5 = scmp.ne.s32.totalorder %s3228_s9, %s3229_s11  ;;  %p3235_p9 = scmp.lt.s32.totalorder %s3233_s22, %s3229_s11 }
  0x3a   : > { %v2144_v23 = vld [vmem:[%s3451_s30 + $0xa0] sm:$0xf]  ;;  %v2864_v24 = vld [vmem:[%s3451_s30 + $0xac] sm:$0xf0]  ;;  %v2545_v25 = vor.u32 %v2964_v22, %v2544_v20  ;;  %1523 = vmatpush.bf16.msra.mxu1 %v2289_v17 }
  0x3b   : > { %v2272_v26 = vld [vmem:[%s3451_s30 + $0x1a0] sm:$0xf]  ;;  %v2896_v27 = vld [vmem:[%s3451_s30 + $0x1ac] sm:$0xf0]  ;;  %v2145_v29 = vor.u32 %v2864_v24, %v2144_v23  ;;  %1537 = vmatpush.bf16.msra.mxu2 %v2417_v21  ;;  %p3231_p6 = pnand %p3230_p5, %p3411_p13  ;;  %p3236_p10 = por %p3235_p9, %p3234_p8 }
  0x3c   : > { %v2400_v28 = vld [vmem:[%s3451_s30 + $0x2a0] sm:$0xf]  ;;  %v2928_v30 = vld [vmem:[%s3451_s30 + $0x2ac] sm:$0xf0]  ;;  %v2273_v33 = vor.u32 %v2896_v27, %v2272_v26  ;;  %1551 = vmatpush.bf16.msra.mxu3 %v2545_v25 }
  0x3d   : > { %v2528_v31 = vld [vmem:[%s3451_s30 + $0x3a0] sm:$0xf]  ;;  %v2960_v32 = vld [vmem:[%s3451_s30 + $0x3ac] sm:$0xf0]  ;;  %v2401_v34 = vor.u32 %v2928_v30, %v2400_v28  ;;  %1510 = vmatpush.bf16.msra.mxu0 %v2145_v29  ;;  %p3232_p7 = pneg %p3231_p6 }
  0x3e   : > { %v2128_v35 = vld [vmem:[%s3451_s30 + $0x80] sm:$0xf]  ;;  %v2860_v36 = vld [vmem:[%s3451_s30 + $0x8c] sm:$0xf0]  ;;  %v2529_v38 = vor.u32 %v2960_v32, %v2528_v31  ;;  %1524 = vmatpush.bf16.msra.mxu1 %v2273_v33  ;;  %v2870_v33 = vld [vmem:[%s3451_s30 + $0xe4] sm:$0xf] }
  0x3f   : > { %v2256_v37 = vld [vmem:[%s3451_s30 + $0x180] sm:$0xf]  ;;  %v2892_v39 = vld [vmem:[%s3451_s30 + $0x18c] sm:$0xf0]  ;;  %v2129_v44 = vor.u32 %v2860_v36, %v2128_v35  ;;  %1538 = vmatpush.bf16.msra.mxu2 %v2401_v34  ;;  %v2178_v34 = vld [vmem:[%s3451_s30 + $0xf0] sm:$0xf0]  ;;  %p3237_p11 = pnand %p3236_p10, %p3232_p7 }
  0x40   : > { %v2384_v40 = vld [vmem:[%s3451_s30 + $0x280] sm:$0xf]  ;;  %v2924_v41 = vld [vmem:[%s3451_s30 + $0x28c] sm:$0xf0]  ;;  %v2257_v45 = vor.u32 %v2892_v39, %v2256_v37  ;;  %1552 = vmatpush.bf16.msra.mxu3 %v2529_v38  ;;  %v2902_v37 = vld [vmem:[%s3451_s30 + $0x1e4] sm:$0xf] }
  0x41   : > { %v2512_v42 = vld [vmem:[%s3451_s30 + $0x380] sm:$0xf]  ;;  %v2956_v43 = vld [vmem:[%s3451_s30 + $0x38c] sm:$0xf0]  ;;  %v2385_v46 = vor.u32 %v2924_v41, %v2384_v40  ;;  %1511 = vmatpush.bf16.msra.mxu0 %v2129_v44  ;;  %v2306_v38 = vld [vmem:[%s3451_s30 + $0x1f0] sm:$0xf0] }
  0x42   : > { %v2112_v47 = vld [vmem:[%s3451_s30 + $0x60] sm:$0xf]  ;;  %v2856_v48 = vld [vmem:[%s3451_s30 + $0x6c] sm:$0xf0]  ;;  %v2513_v50 = vor.u32 %v2956_v43, %v2512_v42  ;;  %1525 = vmatpush.bf16.msra.mxu1 %v2257_v45  ;;  %v2181_v43 = vor.u32 %v2870_v33, %v2178_v34  ;;  %v2114_v33 = vld [vmem:[%s3451_s30 + $0x70] sm:$0xf0] }
  0x43   : > { %v2240_v49 = vld [vmem:[%s3451_s30 + $0x160] sm:$0xf]  ;;  %v2888_v51 = vld [vmem:[%s3451_s30 + $0x16c] sm:$0xf0]  ;;  %v2113_v56 = vor.u32 %v2856_v48, %v2112_v47  ;;  %1539 = vmatpush.bf16.msra.mxu2 %v2385_v46  ;;  %v2309_v47 = vor.u32 %v2902_v37, %v2306_v38  ;;  %v2866_v48 = vld [vmem:[%s3451_s30 + $0xc4] sm:$0xf] }
  0x44   : > { %v2368_v52 = vld [vmem:[%s3451_s30 + $0x260] sm:$0xf]  ;;  %v2920_v53 = vld [vmem:[%s3451_s30 + $0x26c] sm:$0xf0]  ;;  %v2241_v57 = vor.u32 %v2888_v51, %v2240_v49  ;;  %1553 = vmatpush.bf16.msra.mxu3 %v2513_v50  ;;  %v2162_v49 = vld [vmem:[%s3451_s30 + $0xd0] sm:$0xf0] }
  0x45   : > { %v2496_v54 = vld [vmem:[%s3451_s30 + $0x360] sm:$0xf]  ;;  %v2952_v55 = vld [vmem:[%s3451_s30 + $0x36c] sm:$0xf0]  ;;  %v2369_v58 = vor.u32 %v2920_v53, %v2368_v52  ;;  %1512 = vmatpush.bf16.msra.mxu0 %v2113_v56  ;;  %v2898_v50 = vld [vmem:[%s3451_s30 + $0x1c4] sm:$0xf] }
  0x46   : > { %v2096_v59 = vld [vmem:[%s3451_s30 + $0x40] sm:$0xf]  ;;  %v2852_v60 = vld [vmem:[%s3451_s30 + $0x4c] sm:$0xf0]  ;;  %v2497_v62 = vor.u32 %v2952_v55, %v2496_v54  ;;  %1526 = vmatpush.bf16.msra.mxu1 %v2241_v57  ;;  %v2290_v51 = vld [vmem:[%s3451_s30 + $0x1d0] sm:$0xf0] }
  0x47   : > { %v2224_v61 = vld [vmem:[%s3451_s30 + $0x140] sm:$0xf]  ;;  %v2884_v63 = vld [vmem:[%s3451_s30 + $0x14c] sm:$0xf0]  ;;  %v2097_v4 = vor.u32 %v2852_v60, %v2096_v59  ;;  %1540 = vmatpush.bf16.msra.mxu2 %v2369_v58  ;;  %v2839_v53 = vld [vmem:[#allocation3 + $0x14] sm:$0xf0]  ;;  %v2165_v60 = vor.u32 %v2866_v48, %v2162_v49 }
  0x48   : > { %v2352_v0 = vld [vmem:[%s3451_s30 + $0x240] sm:$0xf]  ;;  %v2916_v1 = vld [vmem:[%s3451_s30 + $0x24c] sm:$0xf0]  ;;  %v2225_v5 = vor.u32 %v2884_v63, %v2224_v61  ;;  %1554 = vmatpush.bf16.msra.mxu3 %v2497_v62  ;;  %v2862_v62 = vld [vmem:[%s3451_s30 + $0xa4] sm:$0xf] }
  0x49   : > { %v2480_v2 = vld [vmem:[%s3451_s30 + $0x340] sm:$0xf]  ;;  %v2948_v3 = vld [vmem:[%s3451_s30 + $0x34c] sm:$0xf0]  ;;  %v2353_v6 = vor.u32 %v2916_v1, %v2352_v0  ;;  %1513 = vmatpush.bf16.msra.mxu0 %v2097_v4  ;;  %v2146_v63 = vld [vmem:[%s3451_s30 + $0xb0] sm:$0xf0]  ;;  %v2293_v0 = vor.u32 %v2898_v50, %v2290_v51 }
  0x4a   : > { %v2080_v7 = vld [vmem:[%s3451_s30 + $0x20] sm:$0xf]  ;;  %v2848_v8 = vld [vmem:[%s3451_s30 + $0x2c] sm:$0xf0]  ;;  %v2481_v10 = vor.u32 %v2948_v3, %v2480_v2  ;;  %1527 = vmatpush.bf16.msra.mxu1 %v2225_v5  ;;  %v2894_v1 = vld [vmem:[%s3451_s30 + $0x1a4] sm:$0xf] }
  0x4b   : > { %v2208_v9 = vld [vmem:[%s3451_s30 + $0x120] sm:$0xf]  ;;  %v2880_v11 = vld [vmem:[%s3451_s30 + $0x12c] sm:$0xf0]  ;;  %v2081_v16 = vor.u32 %v2848_v8, %v2080_v7  ;;  %1541 = vmatpush.bf16.msra.mxu2 %v2353_v6  ;;  %v2836_v2 = vld [vmem:[#allocation3 + $0x4] sm:$0xf] }
  0x4c   : > { %v2336_v12 = vld [vmem:[%s3451_s30 + $0x220] sm:$0xf]  ;;  %v2912_v13 = vld [vmem:[%s3451_s30 + $0x22c] sm:$0xf0]  ;;  %v2209_v19 = vor.u32 %v2880_v11, %v2208_v9  ;;  %1555 = vmatpush.bf16.msra.mxu3 %v2481_v10  ;;  %v2042_v3 = vld [vmem:[#allocation3 + $0x18] sm:$0xf0] }
  0x4d   : > { %v2464_v14 = vld [vmem:[%s3451_s30 + $0x320] sm:$0xf]  ;;  %v2944_v15 = vld [vmem:[%s3451_s30 + $0x32c] sm:$0xf0]  ;;  %v2337_v20 = vor.u32 %v2912_v13, %v2336_v12  ;;  %1514 = vmatpush.bf16.msra.mxu0 %v2081_v16  ;;  %v2274_v4 = vld [vmem:[%s3451_s30 + $0x1b0] sm:$0xf0]  ;;  %v3548_v5 = vor.u32 %v2836_v2, %v2042_v3  ;;  %v2149_v13 = vor.u32 %v2862_v62, %v2146_v63 }
  0x4e   : > { %v2064_v17 = vld [vmem:[%s3451_s30] sm:$0xf]  ;;  %v2844_v18 = vld [vmem:[%s3451_s30 + $0xc] sm:$0xf0]  ;;  %v2465_v24 = vor.u32 %v2944_v15, %v2464_v14  ;;  %1528 = vmatpush.bf16.msra.mxu1 %v2209_v19  ;;  %v2048_v6 = vld [vmem:[#allocation3 + $0x8] sm:$0xf] }
  0x4f   : > { %v2192_v21 = vld [vmem:[%s3451_s30 + $0x100] sm:$0xf]  ;;  %v2876_v22 = vld [vmem:[%s3451_s30 + $0x10c] sm:$0xf0]  ;;  %v2065_v31 = vor.u32 %v2844_v18, %v2064_v17  ;;  %1542 = vmatpush.bf16.msra.mxu2 %v2337_v20  ;;  %v2858_v16 = vld [vmem:[%s3451_s30 + $0x84] sm:$0xf]  ;;  %v2277_v17 = vor.u32 %v2894_v1, %v2274_v4 }
  0x50   : > { %v2320_v23 = vld [vmem:[%s3451_s30 + $0x200] sm:$0xf]  ;;  %v2908_v25 = vld [vmem:[%s3451_s30 + $0x20c] sm:$0xf0]  ;;  %v2193_v35 = vor.u32 %v2876_v22, %v2192_v21  ;;  %1556 = vmatpush.bf16.msra.mxu3 %v2465_v24  ;;  %v2130_v18 = vld [vmem:[%s3451_s30 + $0x90] sm:$0xf0] }
  0x51   : > { %v2448_v26 = vld [vmem:[%s3451_s30 + $0x300] sm:$0xf]  ;;  %v2940_v27 = vld [vmem:[%s3451_s30 + $0x30c] sm:$0xf0]  ;;  %v2321_v36 = vor.u32 %v2908_v25, %v2320_v23  ;;  %1515 = vmatpush.bf16.msra.mxu0 %v2065_v31  ;;  %v2837_v19 = vld [vmem:[#allocation3 + $0xc] sm:$0xf] }
  0x52   : > { %v2688_v28 = vld [vmem:[%s3451_s30 + $0x4e0] sm:$0xf]  ;;  %v3000_v29 = vld [vmem:[%s3451_s30 + $0x4ec] sm:$0xf0]  ;;  %v2449_v39 = vor.u32 %v2940_v27, %v2448_v26  ;;  %1529 = vmatpush.bf16.msra.mxu1 %v2193_v35  ;;  %v2050_v20 = vld [vmem:[#allocation3 + $0x20] sm:$0xf0]  ;;  %v2133_v26 = vor.u32 %v2858_v16, %v2130_v18 }
  0x53   : > { %v2816_v30 = vld [vmem:[%s3451_s30 + $0x5e0] sm:$0xf]  ;;  %v3032_v32 = vld [vmem:[%s3451_s30 + $0x5ec] sm:$0xf0]  ;;  %v2689_v40 = vor.u32 %v3000_v29, %v2688_v28  ;;  %1543 = vmatpush.bf16.msra.mxu2 %v2321_v36  ;;  %v2890_v21 = vld [vmem:[%s3451_s30 + $0x184] sm:$0xf]  ;;  %v3562_v23 = vor.u32 %v2837_v19, %v2050_v20 }
  0x54   : > { %v2672_v41 = vld [vmem:[%s3451_s30 + $0x4c0] sm:$0xf]  ;;  %v2817_v42 = vor.u32 %v3032_v32, %v2816_v30  ;;  %v2996_v44 = vld [vmem:[%s3451_s30 + $0x4cc] sm:$0xf0]  ;;  %1557 = vmatpush.bf16.msra.mxu3 %v2449_v39  ;;  %v2258_v22 = vld [vmem:[%s3451_s30 + $0x190] sm:$0xf0] }
  0x55   : > { %v2800_v45 = vld [vmem:[%s3451_s30 + $0x5c0] sm:$0xf]  ;;  %v3028_v46 = vld [vmem:[%s3451_s30 + $0x5cc] sm:$0xf0]  ;;  %1564 = vmatpush.bf16.msrb.mxu0 %v2689_v40  ;;  %v2673_v54 = vor.u32 %v2996_v44, %v2672_v41  ;;  %1530 = vmatmul.bf16.vlgmr.msra.gmra.mxu1 %v3548_v5  ;;  %v2261_v30 = vor.u32 %v2890_v21, %v2258_v22  ;;  %v2854_v32 = vld [vmem:[%s3451_s30 + $0x64] sm:$0xf] }
  0x56   : > { %v2040_v52 = vld [vmem:[#allocation3] sm:$0xf]  ;;  %v2656_v55 = vld [vmem:[%s3451_s30 + $0x4a0] sm:$0xf]  ;;  %1578 = vmatpush.bf16.msrb.mxu1 %v2817_v42  ;;  %v2801_v59 = vor.u32 %v3028_v46, %v2800_v45  ;;  %v2886_v34 = vld [vmem:[%s3451_s30 + $0x164] sm:$0xf]  ;;  %v2117_v38 = vor.u32 %v2854_v32, %v2114_v33 }
  0x57   : > { %v2992_v56 = vld [vmem:[%s3451_s30 + $0x4ac] sm:$0xf0]  ;;  %v2784_v57 = vld [vmem:[%s3451_s30 + $0x5a0] sm:$0xf]  ;;  %v3540_v58 = vor.u32 %v2839_v53, %v2040_v52  ;;  %1592 = vmatpush.bf16.msrb.mxu2 %v2181_v43  ;;  %v2242_v35 = vld [vmem:[%s3451_s30 + $0x170] sm:$0xf0]  ;;  %1558 = vmatmul.bf16.vlgmr.msra.gmra.mxu3 %v3562_v23 }
  0x58   : > { %v3024_v61 = vld [vmem:[%s3451_s30 + $0x5ac] sm:$0xf0]  ;;  %1606 = vmatpush.bf16.msrb.mxu3 %v2309_v47  ;;  %v2657_v8 = vor.u32 %v2992_v56, %v2656_v55  ;;  %v2640_v9 = vld [vmem:[%s3451_s30 + $0x480] sm:$0xf]  ;;  %v2245_v42 = vor.u32 %v2886_v34, %v2242_v35  ;;  %v2850_v44 = vld [vmem:[%s3451_s30 + $0x44] sm:$0xf] }
  0x59   : > { %1516 = vmatmul.bf16.vlgmr.msra.gmra.mxu0 %v3540_v58  ;;  %v2840_v7 = vld [vmem:[#allocation3 + $0x1c] sm:$0xf0]  ;;  %v2785_v12 = vor.u32 %v3024_v61, %v2784_v57  ;;  %v2768_v14 = vld [vmem:[%s3451_s30 + $0x580] sm:$0xf]  ;;  %v2098_v45 = vld [vmem:[%s3451_s30 + $0x50] sm:$0xf0] }
  0x5a   : > { %1565 = vmatpush.bf16.msrb.mxu0 %v2673_v54  ;;  %v2988_v10 = vld [vmem:[%s3451_s30 + $0x48c] sm:$0xf0]  ;;  %v3552_v11 = vor.u32 %v2840_v7, %v2048_v6  ;;  %1579 = vmatpush.bf16.msrb.mxu1 %v2801_v59  ;;  %v2624_v27 = vld [vmem:[%s3451_s30 + $0x460] sm:$0xf]  ;;  %v2882_v46 = vld [vmem:[%s3451_s30 + $0x144] sm:$0xf]  ;;  %v2101_v50 = vor.u32 %v2850_v44, %v2098_v45 }
  0x5b   : > { %1593 = vmatpush.bf16.msrb.mxu2 %v2165_v60  ;;  %v3020_v15 = vld [vmem:[%s3451_s30 + $0x58c] sm:$0xf0]  ;;  %v2641_v24 = vor.u32 %v2988_v10, %v2640_v9  ;;  %v2752_v29 = vld [vmem:[%s3451_s30 + $0x560] sm:$0xf]  ;;  %v2226_v47 = vld [vmem:[%s3451_s30 + $0x150] sm:$0xf0] }
  0x5c   : > { %1607 = vmatpush.bf16.msrb.mxu3 %v2293_v0  ;;  %1544 = vmatmul.bf16.vlgmr.msra.gmra.mxu2 %v3552_v11  ;;  %v2769_v25 = vor.u32 %v3020_v15, %v2768_v14  ;;  %v2984_v28 = vld [vmem:[%s3451_s30 + $0x46c] sm:$0xf0]  ;;  %v2608_v39 = vld [vmem:[%s3451_s30 + $0x440] sm:$0xf]  ;;  %v2229_v54 = vor.u32 %v2882_v46, %v2226_v47  ;;  %v2846_v56 = vld [vmem:[%s3451_s30 + $0x24] sm:$0xf] }
  0x5d   : > { %v3016_v31 = vld [vmem:[%s3451_s30 + $0x56c] sm:$0xf0]  ;;  %v2625_v36 = vor.u32 %v2984_v28, %v2624_v27  ;;  %v2736_v41 = vld [vmem:[%s3451_s30 + $0x540] sm:$0xf]  ;;  %v2082_v57 = vld [vmem:[%s3451_s30 + $0x30] sm:$0xf0] }
  0x5e   : > { %1566 = vmatpush.bf16.msrb.mxu0 %v2657_v8  ;;  %1580 = vmatpush.bf16.msrb.mxu1 %v2785_v12  ;;  %v2753_v37 = vor.u32 %v3016_v31, %v2752_v29  ;;  %v2980_v40 = vld [vmem:[%s3451_s30 + $0x44c] sm:$0xf0]  ;;  %v2592_v51 = vld [vmem:[%s3451_s30 + $0x420] sm:$0xf]  ;;  %v2878_v59 = vld [vmem:[%s3451_s30 + $0x124] sm:$0xf]  ;;  %v2085_v2 = vor.u32 %v2846_v56, %v2082_v57 }
  0x5f   : > { %1594 = vmatpush.bf16.msrb.mxu2 %v2149_v13  ;;  %v3012_v43 = vld [vmem:[%s3451_s30 + $0x54c] sm:$0xf0]  ;;  %v2609_v48 = vor.u32 %v2980_v40, %v2608_v39  ;;  %v2720_v53 = vld [vmem:[%s3451_s30 + $0x520] sm:$0xf]  ;;  %v2210_v60 = vld [vmem:[%s3451_s30 + $0x130] sm:$0xf0] }
  0x60   : > { %1608 = vmatpush.bf16.msrb.mxu3 %v2277_v17  ;;  %v2737_v49 = vor.u32 %v3012_v43, %v2736_v41  ;;  %v2976_v52 = vld [vmem:[%s3451_s30 + $0x42c] sm:$0xf0]  ;;  %v2576_v62 = vld [vmem:[%s3451_s30 + $0x400] sm:$0xf]  ;;  %v2842_v4 = vld [vmem:[%s3451_s30 + $0x4] sm:$0xf]  ;;  %v2213_v7 = vor.u32 %v2878_v59, %v2210_v60 }
  0x61   : > { %v3008_v55 = vld [vmem:[%s3451_s30 + $0x52c] sm:$0xf0]  ;;  %v2593_v61 = vor.u32 %v2976_v52, %v2592_v51  ;;  %v2704_v0 = vld [vmem:[%s3451_s30 + $0x500] sm:$0xf]  ;;  %v2066_v6 = vld [vmem:[%s3451_s30 + $0x10] sm:$0xf0] }
  0x62   : > { %1567 = vmatpush.bf16.msrb.mxu0 %v2641_v24  ;;  %1581 = vmatpush.bf16.msrb.mxu1 %v2769_v25  ;;  %v2972_v63 = vld [vmem:[%s3451_s30 + $0x40c] sm:$0xf0]  ;;  %v2721_v1 = vor.u32 %v3008_v55, %v2720_v53  ;;  %v2874_v8 = vld [vmem:[%s3451_s30 + $0x104] sm:$0xf]  ;;  %v2194_v9 = vld [vmem:[%s3451_s30 + $0x110] sm:$0xf0]  ;;  %v2069_v20 = vor.u32 %v2842_v4, %v2066_v6 }
  0x63   : > { %1595 = vmatpush.bf16.msrb.mxu2 %v2133_v26  ;;  %v3004_v3 = vld [vmem:[%s3451_s30 + $0x50c] sm:$0xf0]  ;;  %v2934_v10 = vld [vmem:[%s3451_s30 + $0x2e4] sm:$0xf]  ;;  %v2434_v12 = vld [vmem:[%s3451_s30 + $0x2f0] sm:$0xf0]  ;;  %v2577_v15 = vor.u32 %v2972_v63, %v2576_v62  ;;  %v2197_v25 = vor.u32 %v2874_v8, %v2194_v9 }
  0x64   : > { %1609 = vmatpush.bf16.msrb.mxu3 %v2261_v30  ;;  %v2966_v13 = vld [vmem:[%s3451_s30 + $0x3e4] sm:$0xf]  ;;  %v2562_v14 = vld [vmem:[%s3451_s30 + $0x3f0] sm:$0xf0]  ;;  %v2705_v19 = vor.u32 %v3004_v3, %v2704_v0  ;;  %v2056_v22 = vld [vmem:[#allocation3 + $0x10] sm:$0xf]  ;;  %v2437_v26 = vor.u32 %v2934_v10, %v2434_v12 }
  0x65   : > { %v2998_v16 = vld [vmem:[%s3451_s30 + $0x4e4] sm:$0xf]  ;;  %v2690_v17 = vld [vmem:[%s3451_s30 + $0x4f0] sm:$0xf0]  ;;  %v2841_v24 = vld [vmem:[#allocation3 + $0x24] sm:$0xf0]  ;;  %v2565_v29 = vor.u32 %v2966_v13, %v2562_v14 }
  0x66   : > { %1568 = vmatpush.bf16.msrb.mxu0 %v2625_v36  ;;  %1582 = vmatpush.bf16.msrb.mxu1 %v2753_v37  ;;  %v3030_v18 = vld [vmem:[%s3451_s30 + $0x5e4] sm:$0xf]  ;;  %v2818_v21 = vld [vmem:[%s3451_s30 + $0x5f0] sm:$0xf0]  ;;  %v2058_v28 = vld [vmem:[#allocation3 + $0x28] sm:$0xf0]  ;;  %v2693_v30 = vor.u32 %v2998_v16, %v2690_v17  ;;  %v3608_v35 = vor.u32 %v2841_v24, %v2056_v22 }
  0x67   : > { %1596 = vmatpush.bf16.msrb.mxu2 %v2117_v38  ;;  %v2838_v27 = vld [vmem:[#allocation3 + $0x14] sm:$0xf]  ;;  %v2418_v32 = vld [vmem:[%s3451_s30 + $0x2d0] sm:$0xf0]  ;;  %v2821_v34 = vor.u32 %v3030_v18, %v2818_v21 }
  0x68   : > { %1610 = vmatpush.bf16.msrb.mxu3 %v2245_v42  ;;  %v2930_v31 = vld [vmem:[%s3451_s30 + $0x2c4] sm:$0xf]  ;;  %v2546_v36 = vld [vmem:[%s3451_s30 + $0x3d0] sm:$0xf0]  ;;  %v3613_v39 = vor.u32 %v2838_v27, %v2058_v28 }
  0x69   : > { %v2962_v33 = vld [vmem:[%s3451_s30 + $0x3c4] sm:$0xf]  ;;  %v2674_v38 = vld [vmem:[%s3451_s30 + $0x4d0] sm:$0xf0]  ;;  %v2421_v42 = vor.u32 %v2930_v31, %v2418_v32 }
  0x6a   : > { %1569 = vmatpush.bf16.msrb.mxu0 %v2609_v48  ;;  %1583 = vmatpush.bf16.msrb.mxu1 %v2737_v49  ;;  %v2994_v37 = vld [vmem:[%s3451_s30 + $0x4c4] sm:$0xf]  ;;  %v2802_v41 = vld [vmem:[%s3451_s30 + $0x5d0] sm:$0xf0]  ;;  %v2549_v43 = vor.u32 %v2962_v33, %v2546_v36 }
  0x6b   : > { %1597 = vmatpush.bf16.msrb.mxu2 %v2101_v50  ;;  %v3026_v40 = vld [vmem:[%s3451_s30 + $0x5c4] sm:$0xf]  ;;  %v2677_v44 = vor.u32 %v2994_v37, %v2674_v38  ;;  %v2402_v46 = vld [vmem:[%s3451_s30 + $0x2b0] sm:$0xf0] }
  0x6c   : > { %1611 = vmatpush.bf16.msrb.mxu3 %v2229_v54  ;;  %v2926_v45 = vld [vmem:[%s3451_s30 + $0x2a4] sm:$0xf]  ;;  %v2805_v48 = vor.u32 %v3026_v40, %v2802_v41  ;;  %v2530_v49 = vld [vmem:[%s3451_s30 + $0x3b0] sm:$0xf0] }
  0x6d   : > { %v2958_v47 = vld [vmem:[%s3451_s30 + $0x3a4] sm:$0xf]  ;;  %v2658_v51 = vld [vmem:[%s3451_s30 + $0x4b0] sm:$0xf0]  ;;  %v2405_v54 = vor.u32 %v2926_v45, %v2402_v46 }
  0x6e   : > { %1570 = vmatpush.bf16.msrb.mxu0 %v2593_v61  ;;  %1584 = vmatpush.bf16.msrb.mxu1 %v2721_v1  ;;  %v2990_v50 = vld [vmem:[%s3451_s30 + $0x4a4] sm:$0xf]  ;;  %v2786_v53 = vld [vmem:[%s3451_s30 + $0x5b0] sm:$0xf0]  ;;  %v2533_v55 = vor.u32 %v2958_v47, %v2530_v49 }
  0x6f   : > { %1598 = vmatpush.bf16.msrb.mxu2 %v2085_v2  ;;  %v3022_v52 = vld [vmem:[%s3451_s30 + $0x5a4] sm:$0xf]  ;;  %v2661_v56 = vor.u32 %v2990_v50, %v2658_v51  ;;  %v2386_v59 = vld [vmem:[%s3451_s30 + $0x290] sm:$0xf0] }
  0x70   : > { %1612 = vmatpush.bf16.msrb.mxu3 %v2213_v7  ;;  %v2922_v57 = vld [vmem:[%s3451_s30 + $0x284] sm:$0xf]  ;;  %v2789_v61 = vor.u32 %v3022_v52, %v2786_v53  ;;  %v2514_v62 = vld [vmem:[%s3451_s30 + $0x390] sm:$0xf0] }
  0x71   : > { %v2954_v60 = vld [vmem:[%s3451_s30 + $0x384] sm:$0xf]  ;;  %v2642_v0 = vld [vmem:[%s3451_s30 + $0x490] sm:$0xf0]  ;;  %v2389_v3 = vor.u32 %v2922_v57, %v2386_v59  ;;  %v2873_v57 = vld [vmem:[%s3451_s30 + $0xf4] sm:$0xf0] }
  0x72   : > { %1571 = vmatpush.bf16.msrb.mxu0 %v2577_v15  ;;  %1585 = vmatpush.bf16.msrb.mxu1 %v2705_v19  ;;  %v2986_v63 = vld [vmem:[%s3451_s30 + $0x484] sm:$0xf]  ;;  %v2770_v2 = vld [vmem:[%s3451_s30 + $0x590] sm:$0xf0]  ;;  %v2517_v4 = vor.u32 %v2954_v60, %v2514_v62  ;;  %v2312_v59 = vld [vmem:[%s3451_s30 + $0x1e8] sm:$0xf] }
  0x73   : > { %1599 = vmatpush.bf16.msrb.mxu2 %v2069_v20  ;;  %v3018_v1 = vld [vmem:[%s3451_s30 + $0x584] sm:$0xf]  ;;  %v2645_v6 = vor.u32 %v2986_v63, %v2642_v0  ;;  %v2370_v8 = vld [vmem:[%s3451_s30 + $0x270] sm:$0xf0]  ;;  %v2440_v62 = vld [vmem:[%s3451_s30 + $0x2e8] sm:$0xf] }
  0x74   : > { %1613 = vmatpush.bf16.msrb.mxu3 %v2197_v25  ;;  %v2918_v7 = vld [vmem:[%s3451_s30 + $0x264] sm:$0xf]  ;;  %v2773_v10 = vor.u32 %v3018_v1, %v2770_v2  ;;  %v2498_v12 = vld [vmem:[%s3451_s30 + $0x370] sm:$0xf0]  ;;  %v2937_v63 = vld [vmem:[%s3451_s30 + $0x2f4] sm:$0xf0] }
  0x75   : > { %1572 = vmatmul.bf16.vlgmr.msrb.gmra.mxu0 %v3608_v35  ;;  %1586 = vmatmul.bf16.vlgmr.msrb.gmra.mxu1 %v3613_v39  ;;  %v2950_v9 = vld [vmem:[%s3451_s30 + $0x364] sm:$0xf]  ;;  %v2626_v14 = vld [vmem:[%s3451_s30 + $0x470] sm:$0xf0]  ;;  %v2373_v17 = vor.u32 %v2918_v7, %v2370_v8  ;;  %v2568_v2 = vld [vmem:[%s3451_s30 + $0x3e8] sm:$0xf]  ;;  %v2441_v8 = vor.u32 %v2937_v63, %v2440_v62 }
  0x76   : > { %1620 = vmatpush.bf16.msra.mxu0 %v2437_v26  ;;  %1634 = vmatpush.bf16.msra.mxu1 %v2565_v29  ;;  %v2982_v13 = vld [vmem:[%s3451_s30 + $0x464] sm:$0xf]  ;;  %v2754_v16 = vld [vmem:[%s3451_s30 + $0x570] sm:$0xf0]  ;;  %v2501_v18 = vor.u32 %v2950_v9, %v2498_v12  ;;  %v2168_v9 = vld [vmem:[%s3451_s30 + $0xc8] sm:$0xf] }
  0x77   : > { %1648 = vmatpush.bf16.msra.mxu2 %v2693_v30  ;;  %1614 = vmatmul.bf16.vlgmr.msrb.gmra.mxu3 %v3548_v5  ;;  %v3014_v15 = vld [vmem:[%s3451_s30 + $0x564] sm:$0xf]  ;;  %v2629_v19 = vor.u32 %v2982_v13, %v2626_v14  ;;  %v2354_v21 = vld [vmem:[%s3451_s30 + $0x250] sm:$0xf0]  ;;  %v2296_v12 = vld [vmem:[%s3451_s30 + $0x1c8] sm:$0xf] }
  0x78   : > { %1662 = vmatpush.bf16.msra.mxu3 %v2821_v34  ;;  %1600 = vmatmul.bf16.vlgmr.msrb.gmra.mxu2 %v3540_v58  ;;  %v2914_v20 = vld [vmem:[%s3451_s30 + $0x244] sm:$0xf]  ;;  %v2757_v24 = vor.u32 %v3014_v15, %v2754_v16  ;;  %v2482_v25 = vld [vmem:[%s3451_s30 + $0x350] sm:$0xf0]  ;;  %v2901_v14 = vld [vmem:[%s3451_s30 + $0x1d4] sm:$0xf0] }
  0x79   : > { %v2946_v22 = vld [vmem:[%s3451_s30 + $0x344] sm:$0xf]  ;;  %v2610_v27 = vld [vmem:[%s3451_s30 + $0x450] sm:$0xf0]  ;;  %v2357_v30 = vor.u32 %v2914_v20, %v2354_v21  ;;  %v2424_v15 = vld [vmem:[%s3451_s30 + $0x2c8] sm:$0xf]  ;;  %v2297_v20 = vor.u32 %v2901_v14, %v2296_v12 }
  0x7a   : > { %1621 = vmatpush.bf16.msra.mxu0 %v2421_v42  ;;  %1635 = vmatpush.bf16.msra.mxu1 %v2549_v43  ;;  %v2978_v26 = vld [vmem:[%s3451_s30 + $0x444] sm:$0xf]  ;;  %v2738_v29 = vld [vmem:[%s3451_s30 + $0x550] sm:$0xf0]  ;;  %v2485_v31 = vor.u32 %v2946_v22, %v2482_v25  ;;  %v2933_v16 = vld [vmem:[%s3451_s30 + $0x2d4] sm:$0xf0] }
  0x7b   : > { %1649 = vmatpush.bf16.msra.mxu2 %v2677_v44  ;;  %v3010_v28 = vld [vmem:[%s3451_s30 + $0x544] sm:$0xf]  ;;  %v2613_v32 = vor.u32 %v2978_v26, %v2610_v27  ;;  %v2338_v34 = vld [vmem:[%s3451_s30 + $0x230] sm:$0xf0]  ;;  %v2425_v21 = vor.u32 %v2933_v16, %v2424_v15  ;;  %v2152_v22 = vld [vmem:[%s3451_s30 + $0xa8] sm:$0xf] }
  0x7c   : > { %1663 = vmatpush.bf16.msra.mxu3 %v2805_v48  ;;  %v2910_v33 = vld [vmem:[%s3451_s30 + $0x224] sm:$0xf]  ;;  %v2741_v37 = vor.u32 %v3010_v28, %v2738_v29  ;;  %v2466_v38 = vld [vmem:[%s3451_s30 + $0x330] sm:$0xf0]  ;;  %v2280_v25 = vld [vmem:[%s3451_s30 + $0x1a8] sm:$0xf] }
  0x7d   : > { %v2942_v36 = vld [vmem:[%s3451_s30 + $0x324] sm:$0xf]  ;;  %v2594_v41 = vld [vmem:[%s3451_s30 + $0x430] sm:$0xf0]  ;;  %v2341_v44 = vor.u32 %v2910_v33, %v2338_v34  ;;  %v2897_v27 = vld [vmem:[%s3451_s30 + $0x1b4] sm:$0xf0] }
  0x7e   : > { %1622 = vmatpush.bf16.msra.mxu0 %v2405_v54  ;;  %1636 = vmatpush.bf16.msra.mxu1 %v2533_v55  ;;  %v2974_v40 = vld [vmem:[%s3451_s30 + $0x424] sm:$0xf]  ;;  %v2722_v43 = vld [vmem:[%s3451_s30 + $0x530] sm:$0xf0]  ;;  %v2469_v47 = vor.u32 %v2942_v36, %v2466_v38  ;;  %v2408_v28 = vld [vmem:[%s3451_s30 + $0x2a8] sm:$0xf]  ;;  %v2281_v33 = vor.u32 %v2897_v27, %v2280_v25 }
  0x7f   : > { %1650 = vmatpush.bf16.msra.mxu2 %v2661_v56  ;;  %v3006_v42 = vld [vmem:[%s3451_s30 + $0x524] sm:$0xf]  ;;  %v2322_v46 = vld [vmem:[%s3451_s30 + $0x210] sm:$0xf0]  ;;  %v2597_v48 = vor.u32 %v2974_v40, %v2594_v41  ;;  %v2184_v56 = vld [vmem:[%s3451_s30 + $0xe8] sm:$0xf] }
  0x80   : > { %1664 = vmatpush.bf16.msra.mxu3 %v2789_v61  ;;  %v2906_v45 = vld [vmem:[%s3451_s30 + $0x204] sm:$0xf]  ;;  %v2450_v50 = vld [vmem:[%s3451_s30 + $0x310] sm:$0xf0]  ;;  %v2725_v52 = vor.u32 %v3006_v42, %v2722_v43  ;;  %v2905_v61 = vld [vmem:[%s3451_s30 + $0x1f4] sm:$0xf0] }
  0x81   : > { %v2938_v49 = vld [vmem:[%s3451_s30 + $0x304] sm:$0xf]  ;;  %v2578_v53 = vld [vmem:[%s3451_s30 + $0x410] sm:$0xf0]  ;;  %v2325_v60 = vor.u32 %v2906_v45, %v2322_v46  ;;  %v2313_v7 = vor.u32 %v2905_v61, %v2312_v59  ;;  %v2929_v29 = vld [vmem:[%s3451_s30 + $0x2b4] sm:$0xf0] }
  0x82   : > { %1623 = vmatpush.bf16.msra.mxu0 %v2389_v3  ;;  %1637 = vmatpush.bf16.msra.mxu1 %v2517_v4  ;;  %v2970_v51 = vld [vmem:[%s3451_s30 + $0x404] sm:$0xf]  ;;  %v2706_v55 = vld [vmem:[%s3451_s30 + $0x510] sm:$0xf0]  ;;  %v2453_v0 = vor.u32 %v2938_v49, %v2450_v50  ;;  %v2969_v3 = vld [vmem:[%s3451_s30 + $0x3f4] sm:$0xf0]  ;;  %v2409_v34 = vor.u32 %v2929_v29, %v2408_v28 }
  0x83   : > { %1651 = vmatpush.bf16.msra.mxu2 %v2645_v6  ;;  %v3002_v54 = vld [vmem:[%s3451_s30 + $0x504] sm:$0xf]  ;;  %v2581_v1 = vor.u32 %v2970_v51, %v2578_v53  ;;  %v2185_v6 = vor.u32 %v2873_v57, %v2184_v56  ;;  %v2569_v13 = vor.u32 %v2969_v3, %v2568_v2  ;;  %v2136_v36 = vld [vmem:[%s3451_s30 + $0x88] sm:$0xf]  ;;  %v2893_v41 = vld [vmem:[%s3451_s30 + $0x194] sm:$0xf0] }
  0x84   : > { %1665 = vmatpush.bf16.msra.mxu3 %v2773_v10  ;;  %v2709_v4 = vor.u32 %v3002_v54, %v2706_v55  ;;  %v2869_v10 = vld [vmem:[%s3451_s30 + $0xd4] sm:$0xf0]  ;;  %v2264_v38 = vld [vmem:[%s3451_s30 + $0x188] sm:$0xf] }
  0x85   : > { %v2392_v42 = vld [vmem:[%s3451_s30 + $0x288] sm:$0xf]  ;;  %v2925_v43 = vld [vmem:[%s3451_s30 + $0x294] sm:$0xf0] }
  0x86   : > { %1624 = vmatpush.bf16.msra.mxu0 %v2373_v17  ;;  %1638 = vmatpush.bf16.msra.mxu1 %v2501_v18  ;;  %v2552_v17 = vld [vmem:[%s3451_s30 + $0x3c8] sm:$0xf]  ;;  %v2965_v18 = vld [vmem:[%s3451_s30 + $0x3d4] sm:$0xf0] }
  0x87   : > { %1652 = vmatpush.bf16.msra.mxu2 %v2629_v19  ;;  %v2169_v19 = vor.u32 %v2869_v10, %v2168_v9  ;;  %v2553_v26 = vor.u32 %v2965_v18, %v2552_v17  ;;  %v2957_v45 = vld [vmem:[%s3451_s30 + $0x394] sm:$0xf0]  ;;  %v2120_v49 = vld [vmem:[%s3451_s30 + $0x68] sm:$0xf] }
  0x88   : > { %1666 = vmatpush.bf16.msra.mxu3 %v2757_v24  ;;  %v2865_v24 = vld [vmem:[%s3451_s30 + $0xb4] sm:$0xf0]  ;;  %v2248_v51 = vld [vmem:[%s3451_s30 + $0x168] sm:$0xf] }
  0x89   : > { %v2857_v50 = vld [vmem:[%s3451_s30 + $0x74] sm:$0xf0]  ;;  %v2376_v54 = vld [vmem:[%s3451_s30 + $0x268] sm:$0xf] }
  0x8a   : > { %1625 = vmatpush.bf16.msra.mxu0 %v2357_v30  ;;  %1639 = vmatpush.bf16.msra.mxu1 %v2485_v31  ;;  %v2536_v30 = vld [vmem:[%s3451_s30 + $0x3a8] sm:$0xf]  ;;  %v2961_v31 = vld [vmem:[%s3451_s30 + $0x3b4] sm:$0xf0]  ;;  %v2121_v59 = vor.u32 %v2857_v50, %v2120_v49 }
  0x8b   : > { %1653 = vmatpush.bf16.msra.mxu2 %v2613_v32  ;;  %v2153_v32 = vor.u32 %v2865_v24, %v2152_v22  ;;  %v2537_v40 = vor.u32 %v2961_v31, %v2536_v30  ;;  %v2889_v53 = vld [vmem:[%s3451_s30 + $0x174] sm:$0xf0]  ;;  %v2504_v56 = vld [vmem:[%s3451_s30 + $0x368] sm:$0xf] }
  0x8c   : > { %1667 = vmatpush.bf16.msra.mxu3 %v2741_v37  ;;  %v2861_v37 = vld [vmem:[%s3451_s30 + $0x94] sm:$0xf0]  ;;  %v2104_v62 = vld [vmem:[%s3451_s30 + $0x48] sm:$0xf] }
  0x8d   : > { %v2137_v46 = vor.u32 %v2861_v37, %v2136_v36  ;;  %v2921_v55 = vld [vmem:[%s3451_s30 + $0x274] sm:$0xf0]  ;;  %v2360_v3 = vld [vmem:[%s3451_s30 + $0x248] sm:$0xf] }
  0x8e   : > { %1626 = vmatpush.bf16.msra.mxu0 %v2341_v44  ;;  %1640 = vmatpush.bf16.msra.mxu1 %v2469_v47  ;;  %v2520_v44 = vld [vmem:[%s3451_s30 + $0x388] sm:$0xf]  ;;  %v2265_v47 = vor.u32 %v2893_v41, %v2264_v38  ;;  %v2953_v57 = vld [vmem:[%s3451_s30 + $0x374] sm:$0xf0]  ;;  %v2377_v61 = vor.u32 %v2921_v55, %v2376_v54  ;;  %v2871_v41 = vld [vmem:[%s3451_s30 + $0xec] sm:$0xf] }
  0x8f   : > { %1654 = vmatpush.bf16.msra.mxu2 %v2597_v48  ;;  %v2393_v48 = vor.u32 %v2925_v43, %v2392_v42  ;;  %v2853_v63 = vld [vmem:[%s3451_s30 + $0x54] sm:$0xf0]  ;;  %v2088_v12 = vld [vmem:[%s3451_s30 + $0x28] sm:$0xf]  ;;  %v2186_v42 = vld [vmem:[%s3451_s30 + $0xf8] sm:$0xf0] }
  0x90   : > { %1668 = vmatpush.bf16.msra.mxu3 %v2725_v52  ;;  %v2521_v52 = vor.u32 %v2957_v45, %v2520_v44  ;;  %v2885_v2 = vld [vmem:[%s3451_s30 + $0x154] sm:$0xf0]  ;;  %v2216_v14 = vld [vmem:[%s3451_s30 + $0x128] sm:$0xf]  ;;  %v2903_v45 = vld [vmem:[%s3451_s30 + $0x1ec] sm:$0xf]  ;;  %v2189_v50 = vor.u32 %v2871_v41, %v2186_v42 }
  0x91   : > { %v2881_v16 = vld [vmem:[%s3451_s30 + $0x134] sm:$0xf0]  ;;  %v2344_v17 = vld [vmem:[%s3451_s30 + $0x228] sm:$0xf] }
  0x92   : > { %1627 = vmatpush.bf16.msra.mxu0 %v2325_v60  ;;  %1641 = vmatpush.bf16.msra.mxu1 %v2453_v0  ;;  %v2249_v60 = vor.u32 %v2889_v53, %v2248_v51  ;;  %v2232_v0 = vld [vmem:[%s3451_s30 + $0x148] sm:$0xf]  ;;  %v2913_v18 = vld [vmem:[%s3451_s30 + $0x234] sm:$0xf0]  ;;  %v2217_v25 = vor.u32 %v2881_v16, %v2216_v14 }
  0x93   : > { %1655 = vmatpush.bf16.msra.mxu2 %v2581_v1  ;;  %v2505_v1 = vor.u32 %v2953_v57, %v2504_v56  ;;  %v2233_v9 = vor.u32 %v2885_v2, %v2232_v0  ;;  %v2072_v22 = vld [vmem:[%s3451_s30 + $0x8] sm:$0xf]  ;;  %v2845_v24 = vld [vmem:[%s3451_s30 + $0x14] sm:$0xf0]  ;;  %v2867_v56 = vld [vmem:[%s3451_s30 + $0xcc] sm:$0xf] }
  0x94   : > { %1669 = vmatpush.bf16.msra.mxu3 %v2709_v4  ;;  %v2917_v4 = vld [vmem:[%s3451_s30 + $0x254] sm:$0xf0]  ;;  %v2200_v27 = vld [vmem:[%s3451_s30 + $0x108] sm:$0xf]  ;;  %v2073_v38 = vor.u32 %v2845_v24, %v2072_v22  ;;  %v2170_v57 = vld [vmem:[%s3451_s30 + $0xd8] sm:$0xf0] }
  0x95   : > { %1628 = vmatmul.bf16.vlgmr.msra.gmra.mxu0 %v3552_v11  ;;  %1642 = vmatmul.bf16.vlgmr.msra.gmra.mxu1 %v3562_v23  ;;  %v2361_v10 = vor.u32 %v2917_v4, %v2360_v3  ;;  %v2877_v28 = vld [vmem:[%s3451_s30 + $0x114] sm:$0xf0]  ;;  %v2328_v29 = vld [vmem:[%s3451_s30 + $0x208] sm:$0xf]  ;;  %v2266_v22 = vld [vmem:[%s3451_s30 + $0x198] sm:$0xf0] }
  0x96   : > { %1676 = vmatpush.bf16.msrb.mxu0 %v2185_v6  ;;  %1690 = vmatpush.bf16.msrb.mxu1 %v2313_v7  ;;  %v2488_v6 = vld [vmem:[%s3451_s30 + $0x348] sm:$0xf]  ;;  %v2949_v7 = vld [vmem:[%s3451_s30 + $0x354] sm:$0xf0]  ;;  %v2201_v43 = vor.u32 %v2877_v28, %v2200_v27 }
  0x97   : > { %1704 = vmatpush.bf16.msrb.mxu2 %v2441_v8  ;;  %1670 = vmatmul.bf16.vlgmr.msra.gmra.mxu3 %v3613_v39  ;;  %v2105_v8 = vor.u32 %v2853_v63, %v2104_v62  ;;  %v2489_v15 = vor.u32 %v2949_v7, %v2488_v6  ;;  %v2909_v31 = vld [vmem:[%s3451_s30 + $0x214] sm:$0xf0]  ;;  %v2824_v37 = vld [vmem:[%s3451_s30 + $0x5e8] sm:$0xf]  ;;  %v2173_v63 = vor.u32 %v2867_v56, %v2170_v57  ;;  %v2863_v6 = vld [vmem:[%s3451_s30 + $0xac] sm:$0xf] }
  0x98   : > { %1718 = vmatpush.bf16.msrb.mxu3 %v2569_v13  ;;  %1656 = vmatmul.bf16.vlgmr.msra.gmra.mxu2 %v3608_v35  ;;  %v2849_v13 = vld [vmem:[%s3451_s30 + $0x34] sm:$0xf0]  ;;  %v2329_v44 = vor.u32 %v2909_v31, %v2328_v29  ;;  %v2680_v51 = vld [vmem:[%s3451_s30 + $0x4c8] sm:$0xf]  ;;  %v2154_v7 = vld [vmem:[%s3451_s30 + $0xb8] sm:$0xf0] }
  0x99   : > { %v3001_v36 = vld [vmem:[%s3451_s30 + $0x4f4] sm:$0xf0]  ;;  %v2808_v53 = vld [vmem:[%s3451_s30 + $0x5c8] sm:$0xf] }
  0x9a   : > { %1677 = vmatpush.bf16.msrb.mxu0 %v2169_v19  ;;  %1691 = vmatpush.bf16.msrb.mxu1 %v2297_v20  ;;  %v2472_v19 = vld [vmem:[%s3451_s30 + $0x328] sm:$0xf]  ;;  %v2945_v20 = vld [vmem:[%s3451_s30 + $0x334] sm:$0xf0] }
  0x9b   : > { %1705 = vmatpush.bf16.msrb.mxu2 %v2425_v21  ;;  %v2089_v21 = vor.u32 %v2849_v13, %v2088_v12  ;;  %v2473_v30 = vor.u32 %v2945_v20, %v2472_v19  ;;  %v3029_v55 = vld [vmem:[%s3451_s30 + $0x5d4] sm:$0xf0]  ;;  %v2664_v0 = vld [vmem:[%s3451_s30 + $0x4a8] sm:$0xf]  ;;  %v2157_v13 = vor.u32 %v2863_v6, %v2154_v7  ;;  %v2859_v19 = vld [vmem:[%s3451_s30 + $0x8c] sm:$0xf] }
  0x9c   : > { %1719 = vmatpush.bf16.msrb.mxu3 %v2553_v26  ;;  %v2345_v26 = vor.u32 %v2913_v18, %v2344_v17  ;;  %v2809_v62 = vor.u32 %v3029_v55, %v2808_v53  ;;  %v2792_v2 = vld [vmem:[%s3451_s30 + $0x5a8] sm:$0xf]  ;;  %v3025_v4 = vld [vmem:[%s3451_s30 + $0x5b4] sm:$0xf0]  ;;  %v2138_v20 = vld [vmem:[%s3451_s30 + $0x98] sm:$0xf0] }
  0x9d   : > { %v2793_v12 = vor.u32 %v3025_v4, %v2792_v2  ;;  %v2648_v14 = vld [vmem:[%s3451_s30 + $0x488] sm:$0xf]  ;;  %v3021_v18 = vld [vmem:[%s3451_s30 + $0x594] sm:$0xf0]  ;;  %v2843_v7 = vld [vmem:[%s3451_s30 + $0xc] sm:$0xf] }
  0x9e   : > { %1678 = vmatpush.bf16.msrb.mxu0 %v2153_v32  ;;  %1692 = vmatpush.bf16.msrb.mxu1 %v2281_v33  ;;  %v2456_v32 = vld [vmem:[%s3451_s30 + $0x308] sm:$0xf]  ;;  %v2941_v33 = vld [vmem:[%s3451_s30 + $0x314] sm:$0xf0] }
  0x9f   : > { %1706 = vmatpush.bf16.msrb.mxu2 %v2409_v34  ;;  %v2696_v34 = vld [vmem:[%s3451_s30 + $0x4e8] sm:$0xf]  ;;  %v2985_v28 = vld [vmem:[%s3451_s30 + $0x474] sm:$0xf0] }
  0xa0   : > { %1720 = vmatpush.bf16.msrb.mxu3 %v2537_v40  ;;  %v3033_v40 = vld [vmem:[%s3451_s30 + $0x5f4] sm:$0xf0]  ;;  %v2776_v16 = vld [vmem:[%s3451_s30 + $0x588] sm:$0xf] }
  0xa1   : > { %v2825_v49 = vor.u32 %v3033_v40, %v2824_v37  ;;  %v2632_v27 = vld [vmem:[%s3451_s30 + $0x468] sm:$0xf]  ;;  %v3017_v31 = vld [vmem:[%s3451_s30 + $0x574] sm:$0xf0] }
  0xa2   : > { %1679 = vmatpush.bf16.msrb.mxu0 %v2137_v46  ;;  %1693 = vmatpush.bf16.msrb.mxu1 %v2265_v47  ;;  %v2314_v46 = vld [vmem:[%s3451_s30 + $0x1f8] sm:$0xf0]  ;;  %v2457_v47 = vor.u32 %v2941_v33, %v2456_v32  ;;  %v2760_v29 = vld [vmem:[%s3451_s30 + $0x568] sm:$0xf]  ;;  %v2855_v32 = vld [vmem:[%s3451_s30 + $0x6c] sm:$0xf]  ;;  %v2633_v37 = vor.u32 %v2985_v28, %v2632_v27 }
  0xa3   : > { %1707 = vmatpush.bf16.msrb.mxu2 %v2393_v48  ;;  %v2697_v48 = vor.u32 %v3001_v36, %v2696_v34  ;;  %v2317_v54 = vor.u32 %v2903_v45, %v2314_v46  ;;  %v2122_v33 = vld [vmem:[%s3451_s30 + $0x78] sm:$0xf0]  ;;  %v2887_v34 = vld [vmem:[%s3451_s30 + $0x16c] sm:$0xf]  ;;  %v2616_v41 = vld [vmem:[%s3451_s30 + $0x448] sm:$0xf] }
  0xa4   : > { %1721 = vmatpush.bf16.msrb.mxu3 %v2521_v52  ;;  %v2997_v52 = vld [vmem:[%s3451_s30 + $0x4d4] sm:$0xf0]  ;;  %v2250_v36 = vld [vmem:[%s3451_s30 + $0x178] sm:$0xf0]  ;;  %v2125_v40 = vor.u32 %v2855_v32, %v2122_v33  ;;  %v2851_v46 = vld [vmem:[%s3451_s30 + $0x4c] sm:$0xf] }
  0xa5   : > { %v2981_v42 = vld [vmem:[%s3451_s30 + $0x454] sm:$0xf0]  ;;  %v2600_v53 = vld [vmem:[%s3451_s30 + $0x428] sm:$0xf]  ;;  %v2554_v33 = vld [vmem:[%s3451_s30 + $0x3d8] sm:$0xf0] }
  0xa6   : > { %1680 = vmatpush.bf16.msrb.mxu0 %v2121_v59  ;;  %1694 = vmatpush.bf16.msrb.mxu1 %v2249_v60  ;;  %v2899_v59 = vld [vmem:[%s3451_s30 + $0x1cc] sm:$0xf]  ;;  %v2298_v60 = vld [vmem:[%s3451_s30 + $0x1d8] sm:$0xf0]  ;;  %v3013_v45 = vld [vmem:[%s3451_s30 + $0x554] sm:$0xf0] }
  0xa7   : > { %1708 = vmatpush.bf16.msrb.mxu2 %v2377_v61  ;;  %v2681_v61 = vor.u32 %v2997_v52, %v2680_v51  ;;  %v2301_v3 = vor.u32 %v2899_v59, %v2298_v60  ;;  %v2728_v55 = vld [vmem:[%s3451_s30 + $0x528] sm:$0xf]  ;;  %v3009_v57 = vld [vmem:[%s3451_s30 + $0x534] sm:$0xf0]  ;;  %v2847_v59 = vld [vmem:[%s3451_s30 + $0x2c] sm:$0xf] }
  0xa8   : > { %1722 = vmatpush.bf16.msrb.mxu3 %v2505_v1  ;;  %v2993_v1 = vld [vmem:[%s3451_s30 + $0x4b4] sm:$0xf0]  ;;  %v2090_v60 = vld [vmem:[%s3451_s30 + $0x38] sm:$0xf0]  ;;  %v2729_v2 = vor.u32 %v3009_v57, %v2728_v55  ;;  %v2712_v4 = vld [vmem:[%s3451_s30 + $0x508] sm:$0xf] }
  0xa9   : > { %v3005_v6 = vld [vmem:[%s3451_s30 + $0x514] sm:$0xf0]  ;;  %v2923_v55 = vld [vmem:[%s3451_s30 + $0x28c] sm:$0xf] }
  0xaa   : > { %1681 = vmatpush.bf16.msrb.mxu0 %v2105_v8  ;;  %1695 = vmatpush.bf16.msrb.mxu1 %v2233_v9  ;;  %v2895_v8 = vld [vmem:[%s3451_s30 + $0x1ac] sm:$0xf]  ;;  %v2282_v9 = vld [vmem:[%s3451_s30 + $0x1b8] sm:$0xf0] }
  0xab   : > { %1709 = vmatpush.bf16.msrb.mxu2 %v2361_v10  ;;  %v2665_v10 = vor.u32 %v2993_v1, %v2664_v0  ;;  %v2285_v17 = vor.u32 %v2895_v8, %v2282_v9  ;;  %v2584_v0 = vld [vmem:[%s3451_s30 + $0x408] sm:$0xf]  ;;  %v2973_v1 = vld [vmem:[%s3451_s30 + $0x414] sm:$0xf0]  ;;  %v2074_v9 = vld [vmem:[%s3451_s30 + $0x18] sm:$0xf0] }
  0xac   : > { %1723 = vmatpush.bf16.msrb.mxu3 %v2489_v15  ;;  %v2989_v15 = vld [vmem:[%s3451_s30 + $0x494] sm:$0xf0]  ;;  %v2955_v57 = vld [vmem:[%s3451_s30 + $0x38c] sm:$0xf] }
  0xad   : > { %v2649_v24 = vor.u32 %v2989_v15, %v2648_v14  ;;  %v2442_v14 = vld [vmem:[%s3451_s30 + $0x2f8] sm:$0xf0]  ;;  %v2967_v15 = vld [vmem:[%s3451_s30 + $0x3ec] sm:$0xf] }
  0xae   : > { %1682 = vmatpush.bf16.msrb.mxu0 %v2089_v21  ;;  %1696 = vmatpush.bf16.msrb.mxu1 %v2217_v25  ;;  %v2891_v21 = vld [vmem:[%s3451_s30 + $0x18c] sm:$0xf]  ;;  %v2777_v25 = vor.u32 %v3021_v18, %v2776_v16  ;;  %v2585_v16 = vor.u32 %v2973_v1, %v2584_v0 }
  0xaf   : > { %1710 = vmatpush.bf16.msrb.mxu2 %v2345_v26  ;;  %v2141_v26 = vor.u32 %v2859_v19, %v2138_v20  ;;  %v2999_v18 = vld [vmem:[%s3451_s30 + $0x4ec] sm:$0xf]  ;;  %v2698_v19 = vld [vmem:[%s3451_s30 + $0x4f8] sm:$0xf0]  ;;  %v2713_v20 = vor.u32 %v3005_v6, %v2712_v4 }
  0xb0   : > { %1724 = vmatpush.bf16.msrb.mxu3 %v2473_v30  ;;  %v2269_v30 = vor.u32 %v2891_v21, %v2266_v22  ;;  %v2077_v21 = vor.u32 %v2843_v7, %v2074_v9  ;;  %v3031_v22 = vld [vmem:[%s3451_s30 + $0x5ec] sm:$0xf]  ;;  %v2701_v28 = vor.u32 %v2999_v18, %v2698_v19  ;;  %v2506_v7 = vld [vmem:[%s3451_s30 + $0x378] sm:$0xf0] }
  0xb1   : > { %v2951_v4 = vld [vmem:[%s3451_s30 + $0x36c] sm:$0xf]  ;;  %v2634_v9 = vld [vmem:[%s3451_s30 + $0x478] sm:$0xf0] }
  0xb2   : > { %1683 = vmatpush.bf16.msrb.mxu0 %v2073_v38  ;;  %1697 = vmatpush.bf16.msrb.mxu1 %v2201_v43  ;;  %v2761_v38 = vor.u32 %v3017_v31, %v2760_v29  ;;  %v2744_v43 = vld [vmem:[%s3451_s30 + $0x548] sm:$0xf]  ;;  %v2931_v29 = vld [vmem:[%s3451_s30 + $0x2cc] sm:$0xf] }
  0xb3   : > { %1711 = vmatpush.bf16.msrb.mxu2 %v2329_v44  ;;  %v2253_v44 = vor.u32 %v2887_v34, %v2250_v36  ;;  %v2745_v51 = vor.u32 %v3013_v45, %v2744_v43  ;;  %v2963_v31 = vld [vmem:[%s3451_s30 + $0x3cc] sm:$0xf]  ;;  %v2682_v36 = vld [vmem:[%s3451_s30 + $0x4d8] sm:$0xf0] }
  0xb4   : > { %1725 = vmatpush.bf16.msrb.mxu3 %v2457_v47  ;;  %v2106_v47 = vld [vmem:[%s3451_s30 + $0x58] sm:$0xf0]  ;;  %v2995_v34 = vld [vmem:[%s3451_s30 + $0x4cc] sm:$0xf] }
  0xb5   : > { %1684 = vmatmul.bf16.vlgmr.msrb.gmra.mxu0 %v3540_v58  ;;  %1698 = vmatmul.bf16.vlgmr.msrb.gmra.mxu1 %v3548_v5  ;;  %v2109_v52 = vor.u32 %v2851_v46, %v2106_v47  ;;  %v2927_v43 = vld [vmem:[%s3451_s30 + $0x2ac] sm:$0xf]  ;;  %v2538_v47 = vld [vmem:[%s3451_s30 + $0x3b8] sm:$0xf0] }
  0xb6   : > { %1732 = vmatpush.bf16.msra.mxu0 %v2697_v48  ;;  %1746 = vmatpush.bf16.msra.mxu1 %v2825_v49  ;;  %v2883_v48 = vld [vmem:[%s3451_s30 + $0x14c] sm:$0xf]  ;;  %v2234_v49 = vld [vmem:[%s3451_s30 + $0x158] sm:$0xf0] }
  0xb7   : > { %1760 = vmatpush.bf16.msra.mxu2 %v2189_v50  ;;  %1726 = vmatmul.bf16.vlgmr.msrb.gmra.mxu3 %v3562_v23  ;;  %v2617_v50 = vor.u32 %v2981_v42, %v2616_v41  ;;  %v2237_v56 = vor.u32 %v2883_v48, %v2234_v49  ;;  %v2557_v41 = vor.u32 %v2963_v31, %v2554_v33  ;;  %v2959_v45 = vld [vmem:[%s3451_s30 + $0x3ac] sm:$0xf]  ;;  %v2666_v49 = vld [vmem:[%s3451_s30 + $0x4b8] sm:$0xf0] }
  0xb8   : > { %1774 = vmatpush.bf16.msra.mxu3 %v2317_v54  ;;  %1712 = vmatmul.bf16.vlgmr.msrb.gmra.mxu2 %v3552_v11  ;;  %v2977_v54 = vld [vmem:[%s3451_s30 + $0x434] sm:$0xf0]  ;;  %v2685_v42 = vor.u32 %v2995_v34, %v2682_v36  ;;  %v2991_v48 = vld [vmem:[%s3451_s30 + $0x4ac] sm:$0xf]  ;;  %v2346_v31 = vld [vmem:[%s3451_s30 + $0x238] sm:$0xf0] }
  0xb9   : > { %v2947_v18 = vld [vmem:[%s3451_s30 + $0x34c] sm:$0xf]  ;;  %v2474_v34 = vld [vmem:[%s3451_s30 + $0x338] sm:$0xf0] }
  0xba   : > { %1733 = vmatpush.bf16.msra.mxu0 %v2681_v61  ;;  %1747 = vmatpush.bf16.msra.mxu1 %v2809_v62  ;;  %v2879_v61 = vld [vmem:[%s3451_s30 + $0x12c] sm:$0xf]  ;;  %v2218_v62 = vld [vmem:[%s3451_s30 + $0x138] sm:$0xf0] }
  0xbb   : > { %1761 = vmatpush.bf16.msra.mxu2 %v2173_v63  ;;  %v2601_v63 = vor.u32 %v2977_v54, %v2600_v53  ;;  %v2221_v8 = vor.u32 %v2879_v61, %v2218_v62  ;;  %v2541_v53 = vor.u32 %v2959_v45, %v2538_v47  ;;  %v2669_v54 = vor.u32 %v2991_v48, %v2666_v49  ;;  %v2650_v61 = vld [vmem:[%s3451_s30 + $0x498] sm:$0xf0]  ;;  %v2975_v36 = vld [vmem:[%s3451_s30 + $0x42c] sm:$0xf] }
  0xbc   : > { %1775 = vmatpush.bf16.msra.mxu3 %v2301_v3  ;;  %v2093_v3 = vor.u32 %v2847_v59, %v2090_v60  ;;  %v2522_v59 = vld [vmem:[%s3451_s30 + $0x398] sm:$0xf0]  ;;  %v2987_v60 = vld [vmem:[%s3451_s30 + $0x48c] sm:$0xf] }
  0xbd   : > { %v2778_v62 = vld [vmem:[%s3451_s30 + $0x598] sm:$0xf0]  ;;  %v2525_v0 = vor.u32 %v2955_v57, %v2522_v59  ;;  %v2653_v1 = vor.u32 %v2987_v60, %v2650_v61  ;;  %v2907_v45 = vld [vmem:[%s3451_s30 + $0x20c] sm:$0xf] }
  0xbe   : > { %1734 = vmatpush.bf16.msra.mxu0 %v2665_v10  ;;  %1748 = vmatpush.bf16.msra.mxu1 %v2793_v12  ;;  %v2875_v10 = vld [vmem:[%s3451_s30 + $0x10c] sm:$0xf]  ;;  %v2202_v12 = vld [vmem:[%s3451_s30 + $0x118] sm:$0xf0] }
  0xbf   : > { %1762 = vmatpush.bf16.msra.mxu2 %v2157_v13  ;;  %v2935_v13 = vld [vmem:[%s3451_s30 + $0x2ec] sm:$0xf]  ;;  %v2458_v49 = vld [vmem:[%s3451_s30 + $0x318] sm:$0xf0] }
  0xc0   : > { %1776 = vmatpush.bf16.msra.mxu3 %v2285_v17  ;;  %v2570_v17 = vld [vmem:[%s3451_s30 + $0x3f8] sm:$0xf0]  ;;  %v2939_v47 = vld [vmem:[%s3451_s30 + $0x30c] sm:$0xf] }
  0xc1   : > { %v2573_v27 = vor.u32 %v2967_v15, %v2570_v17  ;;  %v2362_v17 = vld [vmem:[%s3451_s30 + $0x258] sm:$0xf0] }
  0xc2   : > { %1735 = vmatpush.bf16.msra.mxu0 %v2649_v24  ;;  %1749 = vmatpush.bf16.msra.mxu1 %v2777_v25  ;;  %v2826_v24 = vld [vmem:[%s3451_s30 + $0x5f8] sm:$0xf0]  ;;  %v2205_v25 = vor.u32 %v2875_v10, %v2202_v12  ;;  %v3015_v10 = vld [vmem:[%s3451_s30 + $0x56c] sm:$0xf] }
  0xc3   : > { %1763 = vmatpush.bf16.msra.mxu2 %v2141_v26  ;;  %v2445_v26 = vor.u32 %v2935_v13, %v2442_v14  ;;  %v2829_v32 = vor.u32 %v3031_v22, %v2826_v24  ;;  %v2762_v12 = vld [vmem:[%s3451_s30 + $0x578] sm:$0xf0]  ;;  %v2509_v14 = vor.u32 %v2951_v4, %v2506_v7  ;;  %v3011_v24 = vld [vmem:[%s3451_s30 + $0x54c] sm:$0xf] }
  0xc4   : > { %1777 = vmatpush.bf16.msra.mxu3 %v2269_v30  ;;  %v2426_v30 = vld [vmem:[%s3451_s30 + $0x2d8] sm:$0xf0]  ;;  %v2765_v19 = vor.u32 %v3015_v10, %v2762_v12 }
  0xc5   : > { %v2618_v22 = vld [vmem:[%s3451_s30 + $0x458] sm:$0xf0] }
  0xc6   : > { %1736 = vmatpush.bf16.msra.mxu0 %v2633_v37  ;;  %1750 = vmatpush.bf16.msra.mxu1 %v2761_v38  ;;  %v3027_v37 = vld [vmem:[%s3451_s30 + $0x5cc] sm:$0xf]  ;;  %v2810_v38 = vld [vmem:[%s3451_s30 + $0x5d8] sm:$0xf0] }
  0xc7   : > { %1764 = vmatpush.bf16.msra.mxu2 %v2125_v40  ;;  %v2429_v40 = vor.u32 %v2931_v29, %v2426_v30  ;;  %v2813_v46 = vor.u32 %v3027_v37, %v2810_v38  ;;  %v2911_v30 = vld [vmem:[%s3451_s30 + $0x22c] sm:$0xf]  ;;  %v2602_v37 = vld [vmem:[%s3451_s30 + $0x438] sm:$0xf0] }
  0xc8   : > { %1778 = vmatpush.bf16.msra.mxu3 %v2253_v44  ;;  %v2410_v44 = vld [vmem:[%s3451_s30 + $0x2b8] sm:$0xf0] }
  0xca   : > { %1737 = vmatpush.bf16.msra.mxu0 %v2617_v50  ;;  %1751 = vmatpush.bf16.msra.mxu1 %v2745_v51  ;;  %v3023_v50 = vld [vmem:[%s3451_s30 + $0x5ac] sm:$0xf]  ;;  %v2794_v51 = vld [vmem:[%s3451_s30 + $0x5b8] sm:$0xf0] }
  0xcb   : > { %1765 = vmatpush.bf16.msra.mxu2 %v2109_v52  ;;  %v2413_v52 = vor.u32 %v2927_v43, %v2410_v44  ;;  %v2605_v44 = vor.u32 %v2975_v36, %v2602_v37 }
  0xcc   : > { %1779 = vmatpush.bf16.msra.mxu3 %v2237_v56  ;;  %v2394_v56 = vld [vmem:[%s3451_s30 + $0x298] sm:$0xf0] }
  0xce   : > { %1738 = vmatpush.bf16.msra.mxu0 %v2601_v63  ;;  %1752 = vmatpush.bf16.msra.mxu1 %v2729_v2  ;;  %v2397_v63 = vor.u32 %v2923_v55, %v2394_v56  ;;  %v2919_v2 = vld [vmem:[%s3451_s30 + $0x26c] sm:$0xf]  ;;  %v2461_v55 = vor.u32 %v2939_v47, %v2458_v49 }
  0xcf   : > { %1766 = vmatpush.bf16.msra.mxu2 %v2093_v3  ;;  %v2378_v3 = vld [vmem:[%s3451_s30 + $0x278] sm:$0xf0] }
  0xd0   : > { %1780 = vmatpush.bf16.msra.mxu3 %v2221_v8  ;;  %v2983_v8 = vld [vmem:[%s3451_s30 + $0x46c] sm:$0xf]  ;;  %v2381_v13 = vor.u32 %v2919_v2, %v2378_v3 }
  0xd1   : > { %v2637_v15 = vor.u32 %v2983_v8, %v2634_v9 }
  0xd2   : > { %1739 = vmatpush.bf16.msra.mxu0 %v2585_v16  ;;  %1753 = vmatpush.bf16.msra.mxu1 %v2713_v20  ;;  %v2915_v16 = vld [vmem:[%s3451_s30 + $0x24c] sm:$0xf]  ;;  %v2490_v20 = vld [vmem:[%s3451_s30 + $0x358] sm:$0xf0]  ;;  %v1531_v38 = vpop.f32.mrf.mxu1 }
  0xd3   : > { %1767 = vmatpush.bf16.msra.mxu2 %v2077_v21  ;;  %v2979_v21 = vld [vmem:[%s3451_s30 + $0x44c] sm:$0xf] }
  0xd4   : > { %1781 = vmatpush.bf16.msra.mxu3 %v2205_v25  ;;  %v2746_v25 = vld [vmem:[%s3451_s30 + $0x558] sm:$0xf0] }
  0xd5   : > { %1740 = vmatmul.bf16.vlgmr.msra.gmra.mxu0 %v3608_v35  ;;  %1754 = vmatmul.bf16.vlgmr.msra.gmra.mxu1 %v3613_v39  ;;  %v2749_v33 = vor.u32 %v3011_v24, %v2746_v25 }
  0xd6   : > { %1788 = vmatpush.bf16.msrb.mxu0 %v2445_v26  ;;  %1802 = vmatpush.bf16.msrb.mxu1 %v2573_v27  ;;  %v2365_v26 = vor.u32 %v2915_v16, %v2362_v17  ;;  %v2493_v27 = vor.u32 %v2947_v18, %v2490_v20  ;;  %v1517_v29 = vpop.f32.mrf.mxu0 }
  0xd7   : > { %1816 = vmatpush.bf16.msrb.mxu2 %v2701_v28  ;;  %1782 = vmatmul.bf16.vlgmr.msra.gmra.mxu3 %v3548_v5  ;;  %v3019_v5 = vld [vmem:[%s3451_s30 + $0x58c] sm:$0xf]  ;;  %v2621_v28 = vor.u32 %v2979_v21, %v2618_v22  ;;  %v1532_v57 = vadd.f32 %v1531_v38, %v1517_v29 }
  0xd8   : > { %1830 = vmatpush.bf16.msrb.mxu3 %v2829_v32  ;;  %1768 = vmatmul.bf16.vlgmr.msra.gmra.mxu2 %v3540_v58  ;;  %v2797_v58 = vor.u32 %v3023_v50, %v2794_v51  ;;  %v2781_v6 = vor.u32 %v3019_v5, %v2778_v62  ;;  %v2943_v32 = vld [vmem:[%s3451_s30 + $0x32c] sm:$0xf]  ;;  %v2586_v51 = vld [vmem:[%s3451_s30 + $0x418] sm:$0xf0] }
  0xd9   : > { %v2477_v43 = vor.u32 %v2943_v32, %v2474_v34  ;;  %v2971_v50 = vld [vmem:[%s3451_s30 + $0x40c] sm:$0xf] }
  0xda   : > { %1789 = vmatpush.bf16.msrb.mxu0 %v2429_v40  ;;  %1803 = vmatpush.bf16.msrb.mxu1 %v2557_v41  ;;  %v3007_v40 = vld [vmem:[%s3451_s30 + $0x52c] sm:$0xf]  ;;  %v2730_v41 = vld [vmem:[%s3451_s30 + $0x538] sm:$0xf0]  ;;  %v2589_v56 = vor.u32 %v2971_v50, %v2586_v51  ;;  %v1533_v61 = vpop.f32.mrf.mxu1  ;;  %v1559_v62 = vpop.f32.mrf.mxu3 }
  0xdb   : > { %1817 = vmatpush.bf16.msrb.mxu2 %v2685_v42  ;;  %v2349_v42 = vor.u32 %v2911_v30, %v2346_v31  ;;  %v2733_v48 = vor.u32 %v3007_v40, %v2730_v41 }
  0xdc   : > { %1831 = vmatpush.bf16.msrb.mxu3 %v2813_v46  ;;  %v2330_v46 = vld [vmem:[%s3451_s30 + $0x218] sm:$0xf0] }
  0xde   : > { %1790 = vmatpush.bf16.msrb.mxu0 %v2413_v52  ;;  %1804 = vmatpush.bf16.msrb.mxu1 %v2541_v53  ;;  %v3003_v52 = vld [vmem:[%s3451_s30 + $0x50c] sm:$0xf]  ;;  %v2714_v53 = vld [vmem:[%s3451_s30 + $0x518] sm:$0xf0]  ;;  %v1519_v59 = vpop.f32.mrf.mxu0 }
  0xdf   : > { %1818 = vmatpush.bf16.msrb.mxu2 %v2669_v54  ;;  %v2333_v54 = vor.u32 %v2907_v45, %v2330_v46  ;;  %v1545_v60 = vpop.f32.mrf.mxu2 }
  0xe0   : > { %1832 = vmatpush.bf16.msrb.mxu3 %v2797_v58  ;;  %v2717_v58 = vor.u32 %v3003_v52, %v2714_v53  ;;  %v1546_v5 = vadd.f32 %v1545_v60, %v1532_v57 }
  0xe2   : > { %1791 = vmatpush.bf16.msrb.mxu0 %v2397_v63  ;;  %1805 = vmatpush.bf16.msrb.mxu1 %v2525_v0  ;;  %v1560_v63 = vadd.f32 %v1559_v62, %v1546_v5  ;;  %v3878_v0 = vld [vmem:[%s254_s6] sm:$0xf]  ;;  %v1561_v9 = vpop.f32.mrf.mxu3 }
  0xe3   : > { %1819 = vmatpush.bf16.msrb.mxu2 %v2653_v1  ;;  %v1534_v1 = vadd.f32 %v1533_v61, %v1519_v59  ;;  %v297_v29 = vperm.slane %v3878_v0, 1 }
  0xe4   : > { %1833 = vmatpush.bf16.msrb.mxu3 %v2781_v6  ;;  %v296_v6 = vperm.slane %v3878_v0, 0 }
  0xe6   : > { %1792 = vmatpush.bf16.msrb.mxu0 %v2381_v13  ;;  %1806 = vmatpush.bf16.msrb.mxu1 %v2509_v14 }
  0xe7   : > { %1820 = vmatpush.bf16.msrb.mxu2 %v2637_v15  ;;  %v1547_v3 = vpop.f32.mrf.mxu2 }
  0xe8   : > { %1834 = vmatpush.bf16.msrb.mxu3 %v2765_v19 }
  0xea   : > { %1793 = vmatpush.bf16.msrb.mxu0 %v2365_v26  ;;  %1807 = vmatpush.bf16.msrb.mxu1 %v2493_v27 }
  0xeb   : > { %1821 = vmatpush.bf16.msrb.mxu2 %v2621_v28 }
  0xec   : > { %1835 = vmatpush.bf16.msrb.mxu3 %v2749_v33 }
  0xee   : > { %1794 = vmatpush.bf16.msrb.mxu0 %v2349_v42  ;;  %1808 = vmatpush.bf16.msrb.mxu1 %v2477_v43 }
  0xef   : > { %1822 = vmatpush.bf16.msrb.mxu2 %v2605_v44 }
  0xf0   : > { %1836 = vmatpush.bf16.msrb.mxu3 %v2733_v48 }
  0xf2   : > { %1795 = vmatpush.bf16.msrb.mxu0 %v2333_v54  ;;  %1809 = vmatpush.bf16.msrb.mxu1 %v2461_v55  ;;  %v1573_v2 = vpop.f32.mrf.mxu0  ;;  %v1587_v7 = vpop.f32.mrf.mxu1 }
  0xf3   : > { %1823 = vmatpush.bf16.msrb.mxu2 %v2589_v56  ;;  %v1574_v4 = vadd.f32 %v1573_v2, %v1560_v63  ;;  %v298_v56 = vperm.slane %v3878_v0, 2 }
  0xf4   : > { %1837 = vmatpush.bf16.msrb.mxu3 %v2717_v58 }
  0xf5   : > { %1796 = vmatmul.bf16.vlgmr.msrb.gmra.mxu0 %v3552_v11  ;;  %1810 = vmatmul.bf16.vlgmr.msrb.gmra.mxu1 %v3562_v23  ;;  %v1548_v11 = vadd.f32 %v1547_v3, %v1534_v1  ;;  %v1588_v8 = vadd.f32 %v1587_v7, %v1574_v4 }
  0xf6   : > { %1824 = vmatmul.bf16.vlgmr.msrb.gmra.mxu2 %v3608_v35 }
  0xf7   : > { %1838 = vmatmul.bf16.vlgmr.msrb.gmra.mxu3 %v3613_v39  ;;  %v1844_v23 = vadd.f32 %v1588_v8, %v296_v6  ;;  %v1562_v35 = vadd.f32 %v1561_v9, %v1548_v11 }
  0xf9   : > { %1871 = vst [vmem:[%s3882_s19] sm:$0xff] %v1844_v23 }
  0xfa   : > { %v1575_v39 = vpop.f32.mrf.mxu0  ;;  %v1589_v12 = vpop.f32.mrf.mxu1 }
  0xfb   : > { %v1576_v10 = vadd.f32 %v1575_v39, %v1562_v35  ;;  %v1601_v15 = vpop.f32.mrf.mxu2  ;;  %v1615_v16 = vpop.f32.mrf.mxu3 }
  0xfc   : > { %v1616_v17 = vadd.f32 %v1615_v16, %v1601_v15 }
  0xfd   : > { %v1590_v13 = vadd.f32 %v1589_v12, %v1576_v10 }
  0xff   : > { %v1848_v14 = vadd.f32 %v1590_v13, %v296_v6 }
 0x101   : > { %1875 = vst [vmem:[%s3882_s19 + $0x20] sm:$0xff] %v1848_v14  ;;  %v299_v14 = vperm.slane %v3878_v0, 3 }
 0x103   : > { %v1603_v18 = vpop.f32.mrf.mxu2  ;;  %v1617_v19 = vpop.f32.mrf.mxu3 }
 0x104   : > { %v1618_v26 = vadd.f32 %v1617_v19, %v1603_v18 }
 0x112   : > { %v1629_v20 = vpop.f32.mrf.mxu0  ;;  %v1643_v22 = vpop.f32.mrf.mxu1 }
 0x113   : > { %v1630_v21 = vadd.f32 %v1629_v20, %v1616_v17 }
 0x115   : > { %v1644_v24 = vadd.f32 %v1643_v22, %v1630_v21 }
 0x11a   : > { %v1631_v28 = vpop.f32.mrf.mxu0  ;;  %v1671_v30 = vpop.f32.mrf.mxu3 }
 0x11b   : > { %v1657_v25 = vpop.f32.mrf.mxu2  ;;  %v1632_v31 = vadd.f32 %v1631_v28, %v1618_v26  ;;  %v1645_v33 = vpop.f32.mrf.mxu1 }
 0x11c   : > { %v1658_v27 = vadd.f32 %v1657_v25, %v1644_v24 }
 0x11d   : > { %v1646_v36 = vadd.f32 %v1645_v33, %v1632_v31 }
 0x11e   : > { %v1672_v32 = vadd.f32 %v1671_v30, %v1658_v27 }
 0x120   : > { %v1845_v34 = vadd.f32 %v1672_v32, %v297_v29 }
 0x122   : > { %1872 = vst [vmem:[%s3882_s19 + $0x8] sm:$0xff] %v1845_v34  ;;  %v1673_v40 = vpop.f32.mrf.mxu3 }
 0x123   : > { %v1659_v37 = vpop.f32.mrf.mxu2 }
 0x124   : > { %v1660_v38 = vadd.f32 %v1659_v37, %v1646_v36 }
 0x126   : > { %v1674_v41 = vadd.f32 %v1673_v40, %v1660_v38 }
 0x128   : > { %v1849_v42 = vadd.f32 %v1674_v41, %v297_v29 }
 0x12a   : > { %1876 = vst [vmem:[%s3882_s19 + $0x28] sm:$0xff] %v1849_v42 }
 0x132   : > { %v1685_v43 = vpop.f32.mrf.mxu0  ;;  %v1699_v44 = vpop.f32.mrf.mxu1 }
 0x133   : > { %v1700_v45 = vadd.f32 %v1699_v44, %v1685_v43 }
 0x13a   : > { %v1687_v46 = vpop.f32.mrf.mxu0  ;;  %v1701_v48 = vpop.f32.mrf.mxu1 }
 0x13b   : > { %v1713_v47 = vpop.f32.mrf.mxu2  ;;  %v1727_v50 = vpop.f32.mrf.mxu3  ;;  %v1702_v52 = vadd.f32 %v1701_v48, %v1687_v46 }
 0x13c   : > { %v1714_v49 = vadd.f32 %v1713_v47, %v1700_v45 }
 0x13e   : > { %v1728_v51 = vadd.f32 %v1727_v50, %v1714_v49 }
 0x143   : > { %v1715_v54 = vpop.f32.mrf.mxu2  ;;  %v1729_v60 = vpop.f32.mrf.mxu3 }
 0x144   : > { %v1716_v58 = vadd.f32 %v1715_v54, %v1702_v52 }
 0x146   : > { %v1730_v5 = vadd.f32 %v1729_v60, %v1716_v58 }
 0x152   : > { %v1741_v53 = vpop.f32.mrf.mxu0  ;;  %v1755_v57 = vpop.f32.mrf.mxu1 }
 0x153   : > { %v1742_v55 = vadd.f32 %v1741_v53, %v1728_v51 }
 0x155   : > { %v1756_v59 = vadd.f32 %v1755_v57, %v1742_v55 }
 0x157   : > { %v1846_v61 = vadd.f32 %v1756_v59, %v298_v56 }
 0x159   : > { %1873 = vst [vmem:[%s3882_s19 + $0x10] sm:$0xff] %v1846_v61 }
 0x15a   : > { %v1743_v62 = vpop.f32.mrf.mxu0  ;;  %v1757_v1 = vpop.f32.mrf.mxu1 }
 0x15b   : > { %v1744_v63 = vadd.f32 %v1743_v62, %v1730_v5  ;;  %v1769_v4 = vpop.f32.mrf.mxu2  ;;  %v1783_v6 = vpop.f32.mrf.mxu3 }
 0x15c   : > { %v1784_v11 = vadd.f32 %v1783_v6, %v1769_v4 }
 0x15d   : > { %v1758_v2 = vadd.f32 %v1757_v1, %v1744_v63 }
 0x15f   : > { %v1850_v3 = vadd.f32 %v1758_v2, %v298_v56 }
 0x161   : > { %1877 = vst [vmem:[%s3882_s19 + $0x30] sm:$0xff] %v1850_v3 }
 0x163   : > { %v1771_v7 = vpop.f32.mrf.mxu2  ;;  %v1785_v8 = vpop.f32.mrf.mxu3 }
 0x164   : > { %v1786_v12 = vadd.f32 %v1785_v8, %v1771_v7 }
 0x172   : > { %v1797_v9 = vpop.f32.mrf.mxu0  ;;  %v1811_v35 = vpop.f32.mrf.mxu1 }
 0x173   : > { %v1798_v23 = vadd.f32 %v1797_v9, %v1784_v11 }
 0x175   : > { %v1812_v39 = vadd.f32 %v1811_v35, %v1798_v23 }
 0x179   : > { %v1825_v10 = vpop.f32.mrf.mxu2 }
 0x17a   : > { %v1826_v13 = vadd.f32 %v1825_v10, %v1812_v39  ;;  %v1839_v15 = vpop.f32.mrf.mxu3  ;;  %v1799_v16 = vpop.f32.mrf.mxu0 }
 0x17b   : > { %v1800_v18 = vadd.f32 %v1799_v16, %v1786_v12  ;;  %v1813_v20 = vpop.f32.mrf.mxu1 }
 0x17c   : > { %v1840_v17 = vadd.f32 %v1839_v15, %v1826_v13 }
 0x17d   : > { %v1814_v21 = vadd.f32 %v1813_v20, %v1800_v18 }
 0x17e   : > { %v1847_v19 = vadd.f32 %v1840_v17, %v299_v14 }
 0x180   : > { %1874 = vst [vmem:[%s3882_s19 + $0x18] sm:$0xff] %v1847_v19 }
 0x181   : > { %v1827_v22 = vpop.f32.mrf.mxu2 }
 0x182   : > { %v1828_v24 = vadd.f32 %v1827_v22, %v1814_v21  ;;  %v1841_v0 = vpop.f32.mrf.mxu3 }
 0x184   : > { %v1842_v25 = vadd.f32 %v1841_v0, %v1828_v24 }
 0x186   : > { %v1851_v26 = vadd.f32 %v1842_v25, %v299_v14 }
 0x188   : > { %1878 = vst [vmem:[%s3882_s19 + $0x38] sm:$0xff] %v1851_v26 }
 0x189   : > { %3240 = shalt.err (!%p3237_p11)
}
 0x18a   : > { %s3307_s28 = smov 512   ;;  %s3308_s30 = smov 2048  }
 0x18b   : > { %s3309_s1 = smov 32  }
 0x18c   : > { %3045 = dma.vmem_to_hbm [thread:$0]  (%p3411_p13), %s1896_s7, 1024, %s1898_s8, %s1880_s15, %s3307_s28, %s3308_s30, %s3309_s1  }
 0x18d PF: > { %p3065_p12 = scmp.ge.s32.totalorder %s3299_s17, 2  ;;  %s1912_s6 = sand.u32 1, %s3279_s12  }
 0x18e   : > { %s1913_s10 = scalar_lea.sflag [#allocation5], %s1912_s6 }
 0x18f   : > { %p3059_p2 = pnand %p3065_p12, %p3415_p0 }
 0x191   : > { %p3060_p3 = pneg %p3059_p2 }
 0x193   : > { %3274 = dma.done.wait (%p3060_p3), %s1913_s10, 1024  }
 0x194   : > { %3276 = vsyncadd (%p3060_p3), %s1913_s10, 4294966272  ;;  %s20_s17 = sadd.s32 1, %s3299_s17   ;;  %s3946_s12 = smov %s3283_s13 }
 0x195   : > { %p17_p1 = scmp.ge.s32.totalorder %s20_s17, 6   ;;  %s3947_s13 = smov %s3287_s14 }
 0x196   : > { %s3948_s14 = smov %s3377_s24  ;;  %s3949_s15 = smov %s3295_s16 }
 0x197   : > { %s3950_s16 = smov %s3952_s18  ;;  %19 = sbr.rel (!%p17_p1) target bundleno = 10 (0xa), region = 102 }
 0x19c   :  { %1919 = vsyncpa [#allocation4], 1 }
 0x19d   :  { %1921 = vsyncpa [#allocation4 + $0x1], 1 }
 0x19e   :  { %1922 = vsyncpa [#allocation7], 1 }
 0x19f   :  { %1924 = vsyncpa [#allocation7 + $0x1], 1 }
 0x1a0   :  { %1925 = vsyncpa [#allocation5], 1 }
 0x1a1   :  { %1927 = vsyncpa [#allocation5 + $0x1], 1 }

</bundles_post_ra>
